<compile_context>
chip_gen: v5e
topology: v5e:2x2
jax: 0.10.0
libtpu: 0.0.40
codegen_flags: <defaults>
</compile_context>

<pallas_src>
import functools
import math

import jax
import jax.numpy as jnp
import numpy as np
from jax.experimental import pallas as pl
from jax.experimental.pallas import tpu as pltpu


def _gmc_kernel(*refs, variant, residual, k_heads, f_out):
    # Unpack refs according to the operand list built in the wrapper.
    idx = 0
    adj_ref = refs[idx]; idx += 1            # (tm, tk)            f32
    x_ref = refs[idx]; idx += 1              # (tk, f_in)          f32
    z_ref = refs[idx]; idx += 1              # (tm, K)             f32
    w_hi_ref = refs[idx]; idx += 1           # (f_in, K*f_out)     bf16
    w_h0_ref = None
    h0_ref = None
    if variant:
        w_h0_ref = refs[idx]; idx += 1       # (f_in, K*f_out)     bf16
        h0_ref = refs[idx]; idx += 1         # (tm, f_in)          f32
    res_ref = None
    if residual:
        res_ref = refs[idx]; idx += 1        # (tm, f_in)          input dtype
    out_ref = refs[idx]; idx += 1            # (tm, f_out)         f32
    acc_ref = refs[idx]; idx += 1            # (tm, f_in)          f32 VMEM scratch

    j = pl.program_id(1)

    @pl.when(j == 0)
    def _init():
        acc_ref[...] = jnp.zeros_like(acc_ref)

    # Aggregation: hi(row tile) accumulated over the adj column / x row tiles.
    # In-kernel bf16 cast (VPU) feeding the MXU with f32 accumulation; avoids a
    # separate wrapper-side cast pass over the whole adjacency.
    acc_ref[...] += jnp.dot(adj_ref[...].astype(jnp.bfloat16),
                            x_ref[...].astype(jnp.bfloat16),
                            preferred_element_type=jnp.float32)

    @pl.when(j == pl.num_programs(1) - 1)
    def _finalize():
        # NOTE: hi is re-quantized to bf16 for the (small) head transform; if
        # tighter accuracy is ever required keep it f32 here (MXU multi-pass).
        hi = acc_ref[...].astype(jnp.bfloat16)                # (tm, f_in)

        # One fused matmul for all K heads: (tm, f_in) @ (f_in, K*f_out).
        # Full-ref indexing of the weight blocks (no in-kernel slicing).
        big = jnp.dot(hi, w_hi_ref[...], preferred_element_type=jnp.float32)
        if variant:
            # concat([hi, h0], 1) @ W  ==  hi @ W[:f_in] + h0 @ W[f_in:]
            big = big + jnp.dot(h0_ref[...].astype(jnp.bfloat16), w_h0_ref[...],
                                preferred_element_type=jnp.float32)

        # z-weighted reduction over the K heads (static 128-wide lane slices).
        z = z_ref[...]                                        # (tm, K) f32
        out = z[:, 0:1] * big[:, 0:f_out]
        for k in range(1, k_heads):
            out = out + z[:, k:k + 1] * big[:, k * f_out:(k + 1) * f_out]

        if residual:
            out = out + res_ref[...].astype(jnp.float32)      # exact residual

        out_ref[...] = out.astype(out_ref.dtype)


def _pick_tile(n, cap, min_tiles=1):
    """Largest multiple of 128 dividing n, <= cap, with at least min_tiles tiles."""
    best = None
    t = 128
    while t <= min(cap, n):
        if n % t == 0 and n // t >= min_tiles:
            best = t
        t += 128
    if best is None:
        best = n          # full extent is always a legal block shape
    return best


def graph_multi_convolution(inp, adj, h0, z, weights, *,
                            variant=False, residual=True, tm=None, tk=None):
    """Pallas implementation of GraphMultiConvolution.forward.

    `weights` plays the role of either self.weights or the optional `weights`
    argument of forward() (same shape, same math).
    """
    n, f_in = inp.shape
    k_heads, f_eff, f_out = weights.shape
    assert f_eff == (2 * f_in if variant else f_in)
    if residual:
        # forward() adds `input` directly to the output.
        assert f_out == f_in, "residual=True requires out_features == in_features"

    # ---- tile selection (DMA-bound kernel: big tiles, per-gen VMEM safe) ----
    # Row tile: large for x reuse (x is re-fetched once per row tile), but keep
    # >= 2 row tiles so the "parallel" axis can shard across v7x's 2 TensorCores.
    if tm is None:
        tm = _pick_tile(n, 1024, min_tiles=2)
    # Contraction tile: long DMA bursts; bound so the f32 adj double-buffer
    # stays ~16 MiB (safe even on v7x's 64 MiB physical VMEM).
    if tk is None:
        tk_cap = max(128, min(2048, (16 << 20) // (8 * tm)))
        tk = _pick_tile(n, tk_cap, min_tiles=1)
    assert n % tm == 0 and n % tk == 0, \
        "num_nodes must divide the tile sizes (pad adj/x with zero rows/cols)"

    # Weights are the only operand cast in the wrapper (tiny parameter array).
    # W_flat[:, k*f_out:(k+1)*f_out] == weights[k]  -> one wide (lane-dense) matmul.
    w_flat = jnp.transpose(weights, (1, 0, 2)).reshape(f_eff, k_heads * f_out)
    w_flat = w_flat.astype(jnp.bfloat16)
    w_hi = w_flat[:f_in]                     # (f_in, K*f_out)
    w_h0 = w_flat[f_in:] if variant else None

    z_f = z.astype(jnp.float32)

    operands = [adj, inp, z_f, w_hi]
    in_specs = [
        pl.BlockSpec((tm, tk), lambda i, j: (i, j)),                 # adj tile (f32)
        pl.BlockSpec((tk, f_in), lambda i, j: (j, 0)),               # x (K-tiled, f32)
        pl.BlockSpec((tm, k_heads), lambda i, j: (i, 0)),            # z row tile
        pl.BlockSpec((f_in, k_heads * f_out), lambda i, j: (0, 0)),  # W (hi half)
    ]
    if variant:
        operands.append(w_h0)
        in_specs.append(pl.BlockSpec((f_in, k_heads * f_out), lambda i, j: (0, 0)))
        operands.append(h0)                                          # f32, cast in-kernel
        in_specs.append(pl.BlockSpec((tm, f_in), lambda i, j: (i, 0)))
    if residual:
        operands.append(inp)                                         # exact residual rows
        in_specs.append(pl.BlockSpec((tm, f_in), lambda i, j: (i, 0)))

    kernel = functools.partial(_gmc_kernel, variant=variant, residual=residual,
                               k_heads=k_heads, f_out=f_out)

    # ---- honest cost estimate (adj once, x once per row tile, rest once) ----
    n_row_tiles = n // tm
    flops = (2.0 * n * n * f_in                      # aggregation
             + 2.0 * n * f_eff * k_heads * f_out     # fused K-head transform
             + 2.0 * n * k_heads * f_out             # z-weighted reduction
             + (n * f_out if residual else 0))
    bytes_accessed = (adj.size * adj.dtype.itemsize
                      + n_row_tiles * n * f_in * inp.dtype.itemsize   # x re-reads
                      + z_f.size * 4
                      + w_flat.size * 2
                      + n * f_out * 4                                 # output
                      + (h0.size * h0.dtype.itemsize if variant else 0)
                      + (inp.size * inp.dtype.itemsize if residual else 0))

    # ---- VMEM budget (double buffers + scratch + finalize temp) ----
    vmem_bytes = (
        2 * (tm * tk * 4 + tk * f_in * 4 + tm * k_heads * 4 + tm * f_out * 4)
        + 2 * f_in * k_heads * f_out * 2 * (2 if variant else 1)
        + (2 * tm * f_in * 4 if variant else 0)
        + (2 * tm * f_in * 4 if residual else 0)
        + tm * f_in * 4                           # acc scratch
        + 2 * tm * k_heads * f_out * 4)           # 'big' f32 temp + headroom
    vmem_limit_bytes = int(min(max(vmem_bytes + (8 << 20), 32 << 20), 48 << 20))

    return pl.pallas_call(
        kernel,
        out_shape=jax.ShapeDtypeStruct((n, f_out), jnp.float32),
        grid_spec=pltpu.PrefetchScalarGridSpec(
            num_scalar_prefetch=0,
            grid=(n // tm, n // tk),
            in_specs=in_specs,
            out_specs=pl.BlockSpec((tm, f_out), lambda i, j: (i, 0)),
            scratch_shapes=[pltpu.VMEM((tm, f_in), jnp.float32)],
        ),
        compiler_params=pltpu.CompilerParams(
            dimension_semantics=("parallel", "arbitrary"),
            vmem_limit_bytes=vmem_limit_bytes),
        cost_estimate=pl.CostEstimate(flops=int(flops), transcendentals=0,
                                      bytes_accessed=int(bytes_accessed)),
    )(*operands)


def _reference(inp, adj, h0, z, weights, *, variant, residual):
    hi = adj @ inp
    support = jnp.concatenate([hi, h0], axis=1) if variant else hi
    outputs = jnp.einsum('nf,kfo->nko', support, weights)     # (N, K, F_out)
    out = jnp.sum(z[:, :, None] * outputs, axis=1)            # (N, F_out)
    if residual:
        out = out + inp
    return out


if __name__ == "__main__":
    # Module config: residual=True, variant=False (PyTorch defaults).
    VARIANT = False
    RESIDUAL = True

    N, F_IN, F_OUT, K = 512, 128, 128, 3       # residual requires F_OUT == F_IN
    eff_in = 2 * F_IN if VARIANT else F_IN

    key = jax.random.PRNGKey(0)
    k_x, k_adj, k_h0, k_z, k_w = jax.random.split(key, 5)

    x = jax.random.normal(k_x, (N, F_IN), dtype=jnp.float32)
    adj = jax.random.uniform(k_adj, (N, N), dtype=jnp.float32)
    adj = adj / jnp.sum(adj, axis=1, keepdims=True)            # row-normalized dense adjacency
    h0 = jax.random.normal(k_h0, (N, F_IN), dtype=jnp.float32)
    z = jax.random.uniform(k_z, (N, K), dtype=jnp.float32)
    z = z / jnp.sum(z, axis=1, keepdims=True)                  # per-node mixing coefficients

    # reset_parameters: U(-stdv, stdv), stdv = 1/sqrt(out_features)
    stdv = 1.0 / math.sqrt(F_OUT)
    weights = jax.random.uniform(k_w, (K, eff_in, F_OUT), dtype=jnp.float32,
                                 minval=-stdv, maxval=stdv)

    out = graph_multi_convolution(x, adj, h0, z, weights,
                                  variant=VARIANT, residual=RESIDUAL)
    out = jax.block_until_ready(out)

    ref = _reference(x, adj, h0, z, weights, variant=VARIANT, residual=RESIDUAL)
    # bf16 MXU streams with f32 accumulation -> loosened tolerance vs f32 reference.
    np.testing.assert_allclose(np.asarray(out), np.asarray(ref),
                               rtol=2e-2, atol=2e-2)
    print("KERNEL_OK")
</pallas_src>

<mosaic_0001>
module attributes {stable_mosaic.version = 11 : i64} {
  func.func @_gmc_kernel(%arg0: i32, %arg1: i32, %arg2: memref<256x512xf32, #tpu.memory_space<vmem>>, %arg3: memref<512x128xf32, #tpu.memory_space<vmem>>, %arg4: memref<256x3xf32, #tpu.memory_space<vmem>>, %arg5: memref<128x384xbf16, #tpu.memory_space<vmem>>, %arg6: memref<256x128xf32, #tpu.memory_space<vmem>>, %arg7: memref<256x128xf32, #tpu.memory_space<vmem>>, %arg8: memref<256x128xf32, #tpu.memory_space<vmem>>) attributes {dimension_semantics = [#tpu.dimension_semantics<parallel>, #tpu.dimension_semantics<arbitrary>], iteration_bounds = array<i64: 2, 1>, scalar_prefetch = 0 : i64, scratch_operands = 1 : i64, tpu.core_type = #tpu.core_type<tc>, window_params = [{transform_indices = @transform_0, window_bounds = array<i64: 256, 512>}, {transform_indices = @transform_1, window_bounds = array<i64: 512, 128>}, {transform_indices = @transform_2, window_bounds = array<i64: 256, 3>}, {pipeline_mode = #tpu.pipeline_mode<synchronous>, transform_indices = @transform_3, window_bounds = array<i64: 128, 384>}, {transform_indices = @transform_4, window_bounds = array<i64: 256, 128>}, {transform_indices = @transform_5, window_bounds = array<i64: 256, 128>}]} {
    %c0_i32 = arith.constant 0 : i32
    %0 = arith.cmpi eq, %arg1, %c0_i32 : i32
    %1 = arith.extui %0 : i1 to i32
    %c0_i32_0 = arith.constant 0 : i32
    %2 = arith.cmpi ne, %1, %c0_i32_0 : i32
    scf.if %2 {
      %cst_10 = arith.constant 0.000000e+00 : f32
      %14 = vector.broadcast %cst_10 : f32 to vector<256x128xf32>
      %c0_11 = arith.constant 0 : index
      %c0_12 = arith.constant 0 : index
      %15 = vector.load %arg8[%c0_11, %c0_12] : memref<256x128xf32, #tpu.memory_space<vmem>>, vector<256x128xf32>
      tpu.vector_store %arg8[%c0_11, %c0_12], %14 {strides = array<i32>} : memref<256x128xf32, #tpu.memory_space<vmem>>, vector<256x128xf32>,
    } else {
    }
    %c0 = arith.constant 0 : index
    %c0_1 = arith.constant 0 : index
    %3 = vector.load %arg8[%c0, %c0_1] : memref<256x128xf32, #tpu.memory_space<vmem>>, vector<256x128xf32>
    %c0_2 = arith.constant 0 : index
    %c0_3 = arith.constant 0 : index
    %4 = vector.load %arg2[%c0_2, %c0_3] : memref<256x512xf32, #tpu.memory_space<vmem>>, vector<256x512xf32>
    %5 = arith.truncf %4 : vector<256x512xf32> to vector<256x512xbf16>
    %c0_4 = arith.constant 0 : index
    %c0_5 = arith.constant 0 : index
    %6 = vector.load %arg3[%c0_4, %c0_5] : memref<512x128xf32, #tpu.memory_space<vmem>>, vector<512x128xf32>
    %7 = arith.truncf %6 : vector<512x128xf32> to vector<512x128xbf16>
    %cst = arith.constant dense<0.000000e+00> : vector<256x128xf32>
    %8 = tpu.matmul %5, %7, %cst {dimension_numbers = #tpu.dot_dimension_numbers<[1], [0], [0], [1], [0, 0, 1, 1], [], []>} : vector<256x512xbf16>, vector<512x128xbf16>, vector<256x128xf32> -> vector<256x128xf32>
    %9 = arith.addf %3, %8 : vector<256x128xf32>
    %c0_6 = arith.constant 0 : index
    %c0_7 = arith.constant 0 : index
    %10 = vector.load %arg8[%c0_6, %c0_7] : memref<256x128xf32, #tpu.memory_space<vmem>>, vector<256x128xf32>
    tpu.vector_store %arg8[%c0_6, %c0_7], %9 {strides = array<i32>} : memref<256x128xf32, #tpu.memory_space<vmem>>, vector<256x128xf32>,
    %c0_i32_8 = arith.constant 0 : i32
    %11 = arith.cmpi eq, %arg1, %c0_i32_8 : i32
    %12 = arith.extui %11 : i1 to i32
    %c0_i32_9 = arith.constant 0 : i32
    %13 = arith.cmpi ne, %12, %c0_i32_9 : i32
    scf.if %13 {
      %c0_10 = arith.constant 0 : index
      %c0_11 = arith.constant 0 : index
      %14 = vector.load %arg8[%c0_10, %c0_11] : memref<256x128xf32, #tpu.memory_space<vmem>>, vector<256x128xf32>
      %15 = arith.truncf %14 : vector<256x128xf32> to vector<256x128xbf16>
      %c0_12 = arith.constant 0 : index
      %c0_13 = arith.constant 0 : index
      %16 = vector.load %arg5[%c0_12, %c0_13] : memref<128x384xbf16, #tpu.memory_space<vmem>>, vector<128x384xbf16>
      %cst_14 = arith.constant dense<0.000000e+00> : vector<256x384xf32>
      %17 = tpu.matmul %15, %16, %cst_14 {dimension_numbers = #tpu.dot_dimension_numbers<[1], [0], [0], [1], [0, 0, 1, 1], [], []>} : vector<256x128xbf16>, vector<128x384xbf16>, vector<256x384xf32> -> vector<256x384xf32>
      %c0_15 = arith.constant 0 : index
      %c0_16 = arith.constant 0 : index
      %18 = vector.load %arg4[%c0_15, %c0_16] : memref<256x3xf32, #tpu.memory_space<vmem>>, vector<256x3xf32>
      %19 = vector.extract_strided_slice %18 {offsets = [0, 0], sizes = [256, 1], strides = [1, 1]} : vector<256x3xf32> to vector<256x1xf32>
      %20 = vector.extract_strided_slice %17 {offsets = [0, 0], sizes = [256, 128], strides = [1, 1]} : vector<256x384xf32> to vector<256x128xf32>
      %21 = vector.broadcast %19 : vector<256x1xf32> to vector<256x128xf32>
      %22 = arith.mulf %21, %20 : vector<256x128xf32>
      %23 = vector.extract_strided_slice %18 {offsets = [0, 1], sizes = [256, 1], strides = [1, 1]} : vector<256x3xf32> to vector<256x1xf32>
      %24 = vector.extract_strided_slice %17 {offsets = [0, 128], sizes = [256, 128], strides = [1, 1]} : vector<256x384xf32> to vector<256x128xf32>
      %25 = vector.broadcast %23 : vector<256x1xf32> to vector<256x128xf32>
      %26 = arith.mulf %25, %24 : vector<256x128xf32>
      %27 = arith.addf %22, %26 : vector<256x128xf32>
      %28 = vector.extract_strided_slice %18 {offsets = [0, 2], sizes = [256, 1], strides = [1, 1]} : vector<256x3xf32> to vector<256x1xf32>
      %29 = vector.extract_strided_slice %17 {offsets = [0, 256], sizes = [256, 128], strides = [1, 1]} : vector<256x384xf32> to vector<256x128xf32>
      %30 = vector.broadcast %28 : vector<256x1xf32> to vector<256x128xf32>
      %31 = arith.mulf %30, %29 : vector<256x128xf32>
      %32 = arith.addf %27, %31 : vector<256x128xf32>
      %c0_17 = arith.constant 0 : index
      %c0_18 = arith.constant 0 : index
      %33 = vector.load %arg6[%c0_17, %c0_18] : memref<256x128xf32, #tpu.memory_space<vmem>>, vector<256x128xf32>
      %34 = arith.addf %32, %33 : vector<256x128xf32>
      %c0_19 = arith.constant 0 : index
      %c0_20 = arith.constant 0 : index
      %35 = vector.load %arg7[%c0_19, %c0_20] : memref<256x128xf32, #tpu.memory_space<vmem>>, vector<256x128xf32>
      tpu.vector_store %arg7[%c0_19, %c0_20], %34 {strides = array<i32>} : memref<256x128xf32, #tpu.memory_space<vmem>>, vector<256x128xf32>,
    } else {
    }
    return
  }
  func.func @transform_0(%arg0: i32, %arg1: i32) -> (i32, i32) {
    %c0_i32 = arith.constant 0 : i32
    return %arg0, %arg1 : i32, i32
  }
  func.func @transform_1(%arg0: i32, %arg1: i32) -> (i32, i32) {
    %c0_i32 = arith.constant 0 : i32
    %c0_i32_0 = arith.constant 0 : i32
    return %arg1, %c0_i32 : i32, i32
  }
  func.func @transform_2(%arg0: i32, %arg1: i32) -> (i32, i32) {
    %c0_i32 = arith.constant 0 : i32
    %c0_i32_0 = arith.constant 0 : i32
    return %arg0, %c0_i32 : i32, i32
  }
  func.func @transform_3(%arg0: i32, %arg1: i32) -> (i32, i32) {
    %c0_i32 = arith.constant 0 : i32
    %c0_i32_0 = arith.constant 0 : i32
    %c0_i32_1 = arith.constant 0 : i32
    return %c0_i32, %c0_i32_0 : i32, i32
  }
  func.func @transform_4(%arg0: i32, %arg1: i32) -> (i32, i32) {
    %c0_i32 = arith.constant 0 : i32
    %c0_i32_0 = arith.constant 0 : i32
    return %arg0, %c0_i32 : i32, i32
  }
  func.func @transform_5(%arg0: i32, %arg1: i32) -> (i32, i32) {
    %c0_i32 = arith.constant 0 : i32
    %c0_i32_0 = arith.constant 0 : i32
    return %arg0, %c0_i32 : i32, i32
  }
}

</mosaic_0001>

<bundles_post_ra>
// kernel: tpu_custom_call.1
= control target key start
LH: loop header
LB: loop body
LE: loop exit
PB: predicated region body
PF: predicated region fallthrough
CT: control target
= control target key end

     0   :  { %s4225_s0 = inlined_call_operand.hbm [shape: f32[512,512], index: 0, kind: input, shape index: {}]   ;;  %s4226_s1 = inlined_call_operand.vmem [shape: f32[512,128], index: 1, kind: input, shape index: {}]   ;;  %s4227_s2 = inlined_call_operand.vmem [shape: f32[512,3], index: 2, kind: input, shape index: {}]   ;;  %s4228_s3 = inlined_call_operand.hbm [shape: bf16[128,384], index: 3, kind: input, shape index: {}]   ;;  %s4229_s4 = inlined_call_operand.hbm [shape: f32[512,128], index: 4, kind: input, shape index: {}]   ;;  %s4230_s5 = inlined_call_operand.hbm [shape: f32[512,128], index: 5, kind: output, shape index: {}]  }
   0x1   :  { %4244 = sst [smem:[#allocation64_spill]] %s4225_s0 }
   0x2   :  { %4245 = sst [smem:[#allocation65_spill]] %s4228_s3 }
   0x3   :  { %10 = vsyncpa [#allocation4], 0 }
   0x4   :  { %12 = vsyncpa [#allocation4 + $0x1], 0 }
   0x5   :  { %13 = vsyncpa [#allocation7], 0 }
   0x6   :  { %14 = vsyncpa [#allocation5], 0 }
   0x7   :  { %16 = vsyncpa [#allocation5 + $0x1], 0  ;;  %s2976_s18 = smov 0   ;;  %s2978_s19 = smov 0  }
   0x8   :  { %s2980_s20 = smov 0   ;;  %s2982_s21 = smov 0  }
   0x9   :  { %s2984_s22 = smov 0   ;;  %s2986_s23 = smov 0  }
   0xa LB: > { %4246 = sst [smem:[#allocation14_spill]] %s2928_s22  ;;  %s34_s24 = sadd.s32 1, %s2928_s22  ;;  %s2932_s23 = sphi %s2986_s23, %s22_s23   ;;  %s2928_s22 = sphi %s2984_s22, %s4369_s22   ;;  %s2924_s21 = sphi %s2982_s21, %s4368_s21   ;;  %s2920_s20 = sphi %s2980_s20, %s4372_s20   ;;  %s2916_s19 = sphi %s2978_s19, %s4371_s19   ;;  %s2912_s18 = sphi %s2976_s18, %s4370_s18  }
   0xb   : > { %s43_s25 = sadd.s32 1, %s2920_s20  ;;  %p36_p0 = scmp.ge.s32.totalorder %s34_s24, 2 }
   0xc   : > { %p50_p1 = scmp.ne.s32.totalorder %s2920_s20, %s2916_s19  ;;  %p51_p2 = scmp.eq.s32.totalorder %s2932_s23, 0 }
   0xd   : > { %p2486_p3 = scmp.ge.s32.totalorder %s2932_s23, 2  ;;  %s4374_s24 = smov (%p36_p0, %s34_s24), 0 }
   0xe   : > { %4247 = sst [smem:[#allocation15_spill]] %s4374_s24  ;;  %p3017_p4 = por %p51_p2, %p50_p1 }
   0xf   : > { %p2680_p5 = scmp.lt.s32.totalorder %s2932_s23, 2  ;;  %s38_s27 = ssub.s32 %s2928_s22, %s4374_s24 }
  0x10   : > { %s228_s28 = sand.u32 1, %s2932_s23   ;;  %p41_p6 = scmp.eq.s32.totalorder %s38_s27, 0 }
  0x11   : > { %s230_s29 = sand.u32 1, %s2920_s20   ;;  %s2603_s30 = sshll.u32 %s2928_s22, 10 }
  0x12   : > { %s3028_s6 = scalar_select %p41_p6, %s2920_s20, %s43_s25  }
  0x13   : > { %s2487_s7 = sshll.u32 %s230_s29, 10  ;;  %s4249_s0 = sld [smem:[#allocation64_spill]] }
  0x14   : > { %s232_s12 = scalar_lea.vmem [#allocation3], %s2487_s7  ;;  %p3037_p7 = pnand %p2680_p5, %p3017_p4 }
  0x15   : > { %s243_s13 = sshll.u32 %s232_s12, 4  ;;  %s2491_s15 = sshll.u32 %s230_s29, 8  ;;  %s244_s13 = int_to_ptr.vmem [resolvable:$true] %s243_s13 }
  0x16   : > { %s3041_s16 = scalar_lea.sflag [#allocation4], %s228_s28  ;;  %s2934_s17 = smov 512  }
  0x17   : > { %s2935_s25 = smov 32   ;;  %s266_s27 = scalar_lea.vmem [#allocation8], %s2491_s15 }
  0x18   : > { %s3046_s26 = sshll.u32 %s266_s27, 4  ;;  %s2482_s7 = sadd.s32 4294967294, %s2932_s23   ;;  %s275_s26 = int_to_ptr.vmem [resolvable:$true] %s3046_s26 }
  0x19   : > { %s240_s10 = scalar_lea.hbm %s4249_s0, %s2603_s30  ;;  %s3049_s30 = sadd.s32 4294967295, %s2932_s23  }
  0x1a   : > { %s241_s11 = sshll.u32 %s240_s10, 4  ;;  %p56_p8 = scmp.ne.s32.totalorder %s2916_s19, %s2912_s18  ;;  %s242_s11 = int_to_ptr.hbm [resolvable:$true] %s241_s11 }
  0x1b   : > { %2671 = dma.hbm_to_vmem [thread:$0]  (!%p3037_p7), %s242_s11, 16384, %s244_s13, %s3041_s16, %s2934_s17, %s2934_s17, %s2935_s25  }
  0x1c   : > { %p57_p9 = scmp.eq.s32.totalorder %s3049_s30, 0  ;;  %p179_p10 = scmp.eq.s32.totalorder %s3049_s30, 1 }
  0x1d   : > { %p185_p11 = scmp.eq.s32.totalorder %s2482_s7, 1  ;;  %p2483_p13 = scmp.ge.s32.totalorder %s2932_s23, 1 }
  0x1e   : > { %p3058_p12 = por %p57_p9, %p56_p8  ;;  %p3066_p0 = por %p179_p10, %p50_p1 }
  0x1f   : > { %p3070_p2 = por %p185_p11, %p56_p8  ;;  %p192_p4 = scmp.lt.s32.totalorder %s2932_s23, 3 }
  0x20   : > { %s4254_s3 = sld [smem:[#allocation65_spill]]  ;;  %s2936_s13 = smov [#allocation6]  }
  0x21   : > { %p3078_p5 = pnand %p2483_p13, %p192_p4  ;;  %s214_s15 = sshll.u32 %s2936_s13, 4  ;;  %s215_s15 = int_to_ptr.vmem [resolvable:$true] %s214_s15 }
  0x22   : > { %s2604_s17 = sshll.u32 %s2928_s22, 8  ;;  %s2937_s10 = smov 192  }
  0x23   : > { %p2664_p1 = pneg %p3078_p5  ;;  %s271_s7 = scalar_lea.hbm %s4229_s4, %s2604_s17 }
  0x24   : > { %s272_s9 = sshll.u32 %s271_s7, 4  ;;  %s2938_s0 = smov 12   ;;  %s273_s9 = int_to_ptr.hbm [resolvable:$true] %s272_s9 }
  0x25   : > { %p2665_p6 = pnand %p2664_p1, %p57_p9  ;;  %s2940_s24 = smov 8  }
  0x26   : > { %s212_s11 = sshll.u32 %s4254_s3, 4  ;;  %s2939_s3 = smov 128   ;;  %s213_s11 = int_to_ptr.hbm [resolvable:$true] %s212_s11 }
  0x27   : > { %2667 = dma.hbm_to_vmem [thread:$0]  (!%p2665_p6), %s213_s11, 3072, %s215_s15, [#allocation7], %s2937_s10, %s2937_s10, %s2938_s0  }
  0x28   : > { %2674 = dma.hbm_to_vmem [thread:$0]  (!%p3037_p7), %s273_s9, 4096, %s275_s26, %s3041_s16, %s2939_s3, %s2939_s3, %s2940_s24  }
  0x29   : > { %286 = sbr.rel (%p3078_p5) target bundleno = 816 (0x330), region = 40 }
  0x2e   : > { %s288_s13 = sand.u32 1, %s3049_s30   ;;  %s3098_s22 = sand.u32 1, %s2916_s19  }
  0x2f   : > { %s2495_s17 = sshll.u32 %s3098_s22, 10  ;;  %s289_s25 = scalar_lea.sflag [#allocation4], %s288_s13 }
  0x30   : > { %s3101_s27 = scalar_lea.vmem [#allocation3], %s2495_s17 }
  0x31   : > { %2895 = dma.done.wait (%p3058_p12), %s289_s25, 16384  }
  0x32   : > { %2897 = vsyncadd (%p3058_p12), %s289_s25, 4294950912 }
  0x33   : > { %2899 = dma.done.wait (%p57_p9), [#allocation7], 3072  }
  0x34   : > { %2901 = vsyncadd (%p57_p9), [#allocation7], 4294964224  ;;  %s2497_s0 = sshll.u32 %s3098_s22, 8 }
  0x35   : > { %s3114_s3 = scalar_lea.vmem [#allocation8], %s2497_s0 }
  0x36   : > { %2903 = dma.done.wait (%p3058_p12), %s289_s25, 4096  }
  0x37   : > { %2905 = vsyncadd (%p3058_p12), %s289_s25, 4294963200  ;;  %v640_v0 = vld [vmem:[%s4226_s1 + $0x70] sm:$0xff]  ;;  %v641_v1 = vld [vmem:[%s4226_s1 + $0x78] sm:$0xff]  ;;  %s2499_s24 = sshll.u32 %s2924_s21, 5  ;;  %s2862_s15 = scalar_lea.hbm %s4230_s5, 512 }
  0x38   : > { %v638_v2 = vld [vmem:[%s4226_s1 + $0x60] sm:$0xff]  ;;  %v697_v3 = vpack.c.bf16 %v641_v1, %v640_v0  ;;  %v639_v4 = vld [vmem:[%s4226_s1 + $0x68] sm:$0xff]  ;;  %v636_v6 = vld [vmem:[%s4226_s1 + $0x50] sm:$0xff]  ;;  %p359_p7 = scmp.lt.s32.totalorder %s2499_s24, 63 }
  0x39   : > { %v696_v5 = vpack.c.bf16 %v639_v4, %v638_v2  ;;  %v637_v7 = vld [vmem:[%s4226_s1 + $0x58] sm:$0xff]  ;;  %v656_v8 = vld [vmem:[%s4226_s1 + $0xf0] sm:$0xff]  ;;  %v634_v11 = vld [vmem:[%s4226_s1 + $0x40] sm:$0xff] }
  0x3a   : > { %2630 = vmatpush.bf16.msra.mxu3 %v697_v3  ;;  %722 = vmatpush.bf16.msra.mxu0 %v697_v3  ;;  %v657_v9 = vld [vmem:[%s4226_s1 + $0xf8] sm:$0xff]  ;;  %v695_v10 = vpack.c.bf16 %v637_v7, %v636_v6  ;;  %v635_v13 = vld [vmem:[%s4226_s1 + $0x48] sm:$0xff]  ;;  %v654_v14 = vld [vmem:[%s4226_s1 + $0xe0] sm:$0xff]  ;;  %s4376_s24 = smov (!%p359_p7, %s2499_s24), 63 }
  0x3b   : > { %v705_v12 = vpack.c.bf16 %v657_v9, %v656_v8  ;;  %v655_v15 = vld [vmem:[%s4226_s1 + $0xe8] sm:$0xff]  ;;  %v694_v16 = vpack.c.bf16 %v635_v13, %v634_v11  ;;  %v632_v18 = vld [vmem:[%s4226_s1 + $0x30] sm:$0xff]  ;;  %v633_v19 = vld [vmem:[%s4226_s1 + $0x38] sm:$0xff]  ;;  %s2500_s7 = sshll.u32 %s4376_s24, 3 }
  0x3c   : > { %v704_v17 = vpack.c.bf16 %v655_v15, %v654_v14  ;;  %v693_v20 = vpack.c.bf16 %v633_v19, %v632_v18  ;;  %v630_v21 = vld [vmem:[%s4226_s1 + $0x20] sm:$0xff]  ;;  %v631_v22 = vld [vmem:[%s4226_s1 + $0x28] sm:$0xff]  ;;  %v652_v23 = vld [vmem:[%s4226_s1 + $0xd0] sm:$0xff]  ;;  %s3364_s13 = scalar_lea.vmem %s4227_s2, %s2500_s7 }
  0x3d   : > { %811 = vmatpush.bf16.msra.mxu1 %v705_v12  ;;  %v653_v24 = vld [vmem:[%s4226_s1 + $0xd8] sm:$0xff]  ;;  %v692_v25 = vpack.c.bf16 %v631_v22, %v630_v21  ;;  %v628_v26 = vld [vmem:[%s4226_s1 + $0x10] sm:$0xff]  ;;  %v650_v29 = vld [vmem:[%s4226_s1 + $0xc0] sm:$0xff] }
  0x3e   : > { %2631 = vmatpush.bf16.msra.mxu3 %v696_v5  ;;  %723 = vmatpush.bf16.msra.mxu0 %v696_v5  ;;  %v703_v27 = vpack.c.bf16 %v653_v24, %v652_v23  ;;  %v629_v28 = vld [vmem:[%s4226_s1 + $0x18] sm:$0xff]  ;;  %v651_v30 = vld [vmem:[%s4226_s1 + $0xc8] sm:$0xff]  ;;  %v626_v33 = vld [vmem:[%s4226_s1] sm:$0xff] }
  0x3f   : > { %v691_v31 = vpack.c.bf16 %v629_v28, %v628_v26  ;;  %v702_v32 = vpack.c.bf16 %v651_v30, %v650_v29  ;;  %v627_v34 = vld [vmem:[%s4226_s1 + $0x8] sm:$0xff]  ;;  %v530_v36 = vld [vmem:[%s3101_s27 + $0x300] sm:$0xff]  ;;  %v648_v39 = vld [vmem:[%s4226_s1 + $0xb0] sm:$0xff] }
  0x40   : > { %v690_v35 = vpack.c.bf16 %v627_v34, %v626_v33  ;;  %v534_v37 = vld [vmem:[%s3101_s27 + $0x320] sm:$0xff]  ;;  %v649_v40 = vld [vmem:[%s4226_s1 + $0xb8] sm:$0xff]  ;;  %v647_v43 = vld [vmem:[%s4226_s1 + $0xa8] sm:$0xff] }
  0x41   : > { %812 = vmatpush.bf16.msra.mxu1 %v704_v17  ;;  %v610_v38 = vpack.c.bf16 %v534_v37, %v530_v36  ;;  %v701_v41 = vpack.c.bf16 %v649_v40, %v648_v39  ;;  %v646_v42 = vld [vmem:[%s4226_s1 + $0xa0] sm:$0xff]  ;;  %v644_v48 = vld [vmem:[%s4226_s1 + $0x90] sm:$0xff]  ;;  %v645_v49 = vld [vmem:[%s4226_s1 + $0x98] sm:$0xff] }
  0x42   : > { %2632 = vmatpush.bf16.msra.mxu3 %v695_v10  ;;  %724 = vmatpush.bf16.msra.mxu0 %v695_v10  ;;  %v700_v44 = vpack.c.bf16 %v647_v43, %v646_v42  ;;  %v538_v45 = vld [vmem:[%s3101_s27 + $0x340] sm:$0xff]  ;;  %v699_v50 = vpack.c.bf16 %v645_v49, %v644_v48  ;;  %v643_v52 = vld [vmem:[%s4226_s1 + $0x88] sm:$0xff]  ;;  %v672_v57 = vld [vmem:[%s4226_s1 + $0x170] sm:$0xff] }
  0x43   : > { %v542_v46 = vld [vmem:[%s3101_s27 + $0x360] sm:$0xff]  ;;  %v673_v58 = vld [vmem:[%s4226_s1 + $0x178] sm:$0xff]  ;;  %v671_v61 = vld [vmem:[%s4226_s1 + $0x168] sm:$0xff] }
  0x44   : > { %v614_v47 = vpack.c.bf16 %v542_v46, %v538_v45  ;;  %v642_v51 = vld [vmem:[%s4226_s1 + $0x80] sm:$0xff]  ;;  %v713_v60 = vpack.c.bf16 %v673_v58, %v672_v57  ;;  %v668_v2 = vld [vmem:[%s4226_s1 + $0x150] sm:$0xff]  ;;  %v669_v3 = vld [vmem:[%s4226_s1 + $0x158] sm:$0xff] }
  0x45   : > { %813 = vmatpush.bf16.msra.mxu1 %v703_v27  ;;  %v698_v53 = vpack.c.bf16 %v643_v52, %v642_v51  ;;  %v546_v54 = vld [vmem:[%s3101_s27 + $0x380] sm:$0xff]  ;;  %v711_v5 = vpack.c.bf16 %v669_v3, %v668_v2  ;;  %v667_v6 = vld [vmem:[%s4226_s1 + $0x148] sm:$0xff]  ;;  %v664_v11 = vld [vmem:[%s4226_s1 + $0x130] sm:$0xff] }
  0x46   : > { %2633 = vmatpush.bf16.msra.mxu3 %v694_v16  ;;  %725 = vmatpush.bf16.msra.mxu0 %v694_v16  ;;  %v550_v55 = vld [vmem:[%s3101_s27 + $0x3a0] sm:$0xff]  ;;  %v531_v8 = vld [vmem:[%s3101_s27 + $0x308] sm:$0xff]  ;;  %v661_v21 = vld [vmem:[%s4226_s1 + $0x118] sm:$0xff] }
  0x47   : > { %v618_v56 = vpack.c.bf16 %v550_v55, %v546_v54  ;;  %v670_v59 = vld [vmem:[%s4226_s1 + $0x160] sm:$0xff]  ;;  %900 = vmatpush.bf16.msra.mxu2 %v713_v60  ;;  %v535_v9 = vld [vmem:[%s3101_s27 + $0x328] sm:$0xff]  ;;  %v688_v29 = vld [vmem:[%s4226_s1 + $0x1f0] sm:$0xff] }
  0x48   : > { %v712_v62 = vpack.c.bf16 %v671_v61, %v670_v59  ;;  %v554_v63 = vld [vmem:[%s3101_s27 + $0x3c0] sm:$0xff]  ;;  %v611_v10 = vpack.c.bf16 %v535_v9, %v531_v8  ;;  %v663_v15 = vld [vmem:[%s4226_s1 + $0x128] sm:$0xff]  ;;  %v689_v30 = vld [vmem:[%s4226_s1 + $0x1f8] sm:$0xff] }
  0x49   : > { %814 = vmatpush.bf16.msra.mxu1 %v702_v32  ;;  %v558_v0 = vld [vmem:[%s3101_s27 + $0x3e0] sm:$0xff]  ;;  %v543_v18 = vld [vmem:[%s3101_s27 + $0x368] sm:$0xff]  ;;  %v440_v33 = vld [vmem:[%s3101_s27 + $0x30] sm:$0xff] }
  0x4a   : > { %2634 = vmatpush.bf16.msra.mxu3 %v693_v20  ;;  %726 = vmatpush.bf16.msra.mxu0 %v693_v20  ;;  %v622_v1 = vpack.c.bf16 %v558_v0, %v554_v63  ;;  %v666_v4 = vld [vmem:[%s4226_s1 + $0x140] sm:$0xff]  ;;  %v660_v20 = vld [vmem:[%s4226_s1 + $0x110] sm:$0xff]  ;;  %v659_v24 = vld [vmem:[%s4226_s1 + $0x108] sm:$0xff] }
  0x4b   : > { %901 = vmatpush.bf16.msra.mxu2 %v712_v62  ;;  %v710_v7 = vpack.c.bf16 %v667_v6, %v666_v4  ;;  %v662_v13 = vld [vmem:[%s4226_s1 + $0x120] sm:$0xff]  ;;  %v707_v23 = vpack.c.bf16 %v661_v21, %v660_v20  ;;  %v547_v26 = vld [vmem:[%s3101_s27 + $0x388] sm:$0xff]  ;;  %v685_v48 = vld [vmem:[%s4226_s1 + $0x1d8] sm:$0xff] }
  0x4c   : > { %v708_v16 = vpack.c.bf16 %v663_v15, %v662_v13  ;;  %v658_v22 = vld [vmem:[%s4226_s1 + $0x100] sm:$0xff]  ;;  %v687_v36 = vld [vmem:[%s4226_s1 + $0x1e8] sm:$0xff]  ;;  %v2595_v49 = vld [vmem:[#allocation6 + $0xb0] sm:$0xf] }
  0x4d   : > { %815 = vmatpush.bf16.msra.mxu1 %v701_v41  ;;  %v686_v34 = vld [vmem:[%s4226_s1 + $0x1e0] sm:$0xff]  ;;  %v559_v39 = vld [vmem:[%s3101_s27 + $0x3e8] sm:$0xff]  ;;  %v2628_v51 = vld [vmem:[#allocation6 + $0xb8] sm:$0xf0] }
  0x4e   : > { %2635 = vmatpush.bf16.msra.mxu3 %v692_v25  ;;  %727 = vmatpush.bf16.msra.mxu0 %v692_v25  ;;  %v706_v25 = vpack.c.bf16 %v659_v24, %v658_v22  ;;  %v720_v37 = vpack.c.bf16 %v687_v36, %v686_v34  ;;  %v434_v40 = vld [vmem:[%s3101_s27] sm:$0xff]  ;;  %v435_v42 = vld [vmem:[%s3101_s27 + $0x8] sm:$0xff]  ;;  %v2596_v52 = vor.u32 %v2628_v51, %v2595_v49  ;;  %v2627_v54 = vld [vmem:[#allocation6 + $0xb0] sm:$0xf0] }
  0x4f   : > { %902 = vmatpush.bf16.msra.mxu2 %v711_v5  ;;  %v2626_v55 = vld [vmem:[#allocation6 + $0xac] sm:$0xf]  ;;  %v2589_v57 = vld [vmem:[#allocation6 + $0xb4] sm:$0xf0]  ;;  %v444_v58 = vld [vmem:[%s3101_s27 + $0x50] sm:$0xff] }
  0x50   : > { %v448_v59 = vld [vmem:[%s3101_s27 + $0x70] sm:$0xff]  ;;  %v683_v63 = vld [vmem:[%s4226_s1 + $0x1c8] sm:$0xff]  ;;  %v442_v3 = vld [vmem:[%s3101_s27 + $0x40] sm:$0xff] }
  0x51   : > { %816 = vmatpush.bf16.msra.mxu1 %v700_v44  ;;  %v568_v61 = vpack.c.bf16 %v448_v59, %v444_v58  ;;  %v536_v2 = vld [vmem:[%s3101_s27 + $0x330] sm:$0xff]  ;;  %v446_v4 = vld [vmem:[%s3101_s27 + $0x60] sm:$0xff] }
  0x52   : > { %2636 = vmatpush.bf16.msra.mxu3 %v691_v31  ;;  %728 = vmatpush.bf16.msra.mxu0 %v691_v31  ;;  %v721_v31 = vpack.c.bf16 %v689_v30, %v688_v29  ;;  %v566_v6 = vpack.c.bf16 %v446_v4, %v442_v3  ;;  %v456_v15 = vld [vmem:[%s3101_s27 + $0xb0] sm:$0xff]  ;;  %v2625_v20 = vld [vmem:[#allocation6 + $0xa0] sm:$0xf0]  ;;  %v455_v29 = vld [vmem:[%s3101_s27 + $0xa8] sm:$0xff] }
  0x53   : > { %903 = vmatpush.bf16.msra.mxu2 %v710_v7  ;;  %v544_v24 = vld [vmem:[%s3101_s27 + $0x370] sm:$0xff]  ;;  %v458_v51 = vld [vmem:[%s3101_s27 + $0xc0] sm:$0xff]  ;;  %v2620_v4 = vld [vmem:[#allocation6 + $0x7c] sm:$0xf] }
  0x54   : > { %v2623_v34 = vld [vmem:[#allocation6 + $0x94] sm:$0xf]  ;;  %v3376_v59 = vld [vmem:[%s3364_s13] sm:$0xff] }
  0x55   : > { %817 = vmatpush.bf16.msra.mxu1 %v699_v50  ;;  %v548_v49 = vld [vmem:[%s3101_s27 + $0x390] sm:$0xff]  ;;  %v2621_v3 = vld [vmem:[#allocation6 + $0x80] sm:$0xf0] }
  0x56   : > { %2637 = vmatpush.bf16.msra.mxu3 %v690_v35  ;;  %729 = vmatpush.bf16.msra.mxu0 %v690_v35  ;;  %v3373_v58 = vld [vmem:[%s3364_s13 + $0x10] sm:$0xff] }
  0x59   : > { %790 = vmatmul.bf16.vlgmr.msra.gmra.mxu3 %v610_v38  ;;  %818 = vmatpush.bf16.msra.mxu1 %v698_v53  ;;  %v555_v38 = vld [vmem:[%s3101_s27 + $0x3c8] sm:$0xff] }
  0x5a   : > { %2638 = vmatpush.bf16.msrb.mxu3 %v705_v12  ;;  %v665_v12 = vld [vmem:[%s4226_s1 + $0x138] sm:$0xff]  ;;  %v623_v46 = vpack.c.bf16 %v559_v39, %v555_v38  ;;  %v676_v39 = vld [vmem:[%s4226_s1 + $0x190] sm:$0xff] }
  0x5b   : > { %v709_v14 = vpack.c.bf16 %v665_v12, %v664_v11  ;;  %v681_v11 = vld [vmem:[%s4226_s1 + $0x1b8] sm:$0xff] }
  0x5d   : > { %904 = vmatpush.bf16.msra.mxu2 %v709_v14 }
  0x5e   : > { %2639 = vmatpush.bf16.msrb.mxu3 %v704_v17  ;;  %v539_v17 = vld [vmem:[%s3101_s27 + $0x348] sm:$0xff] }
  0x5f   : > { %v615_v19 = vpack.c.bf16 %v543_v18, %v539_v17  ;;  %v679_v18 = vld [vmem:[%s4226_s1 + $0x1a8] sm:$0xff] }
  0x61   : > { %905 = vmatpush.bf16.msra.mxu2 %v708_v16 }
  0x62   : > { %2640 = vmatpush.bf16.msrb.mxu3 %v703_v27  ;;  %v551_v27 = vld [vmem:[%s3101_s27 + $0x3a8] sm:$0xff] }
  0x63   : > { %v619_v28 = vpack.c.bf16 %v551_v27, %v547_v26  ;;  %v454_v26 = vld [vmem:[%s3101_s27 + $0xa0] sm:$0xff]  ;;  %v451_v27 = vld [vmem:[%s3101_s27 + $0x88] sm:$0xff] }
  0x65   : > { %906 = vmatpush.bf16.msra.mxu2 %v707_v23 }
  0x66   : > { %2641 = vmatpush.bf16.msrb.mxu3 %v702_v32  ;;  %v436_v32 = vld [vmem:[%s3101_s27 + $0x10] sm:$0xff] }
  0x67   : > { %v564_v35 = vpack.c.bf16 %v440_v33, %v436_v32  ;;  %v2575_v32 = vld [vmem:[#allocation6 + $0x90] sm:$0xf]  ;;  %v2624_v33 = vld [vmem:[#allocation6 + $0x98] sm:$0xf0] }
  0x68   : > { %v2576_v36 = vor.u32 %v2624_v33, %v2575_v32  ;;  %v476_v32 = vld [vmem:[%s3101_s27 + $0x150] sm:$0xff] }
  0x69   : > { %795 = vmatmul.bf16.gmra.mxu3 %v614_v47  ;;  %907 = vmatpush.bf16.msra.mxu2 %v706_v25  ;;  %v684_v47 = vld [vmem:[%s4226_s1 + $0x1d0] sm:$0xff] }
  0x6a   : > { %2642 = vmatpush.bf16.msrb.mxu3 %v701_v41  ;;  %v438_v41 = vld [vmem:[%s3101_s27 + $0x20] sm:$0xff]  ;;  %v480_v33 = vld [vmem:[%s3101_s27 + $0x170] sm:$0xff] }
  0x6b   : > { %v562_v43 = vpack.c.bf16 %v438_v41, %v434_v40  ;;  %v677_v40 = vld [vmem:[%s4226_s1 + $0x198] sm:$0xff] }
  0x6c   : > { %908 = vmatmul.bf16.vlgmr.msra.gmra.mxu2 %v564_v35  ;;  %v715_v41 = vpack.c.bf16 %v677_v40, %v676_v39  ;;  %v441_v39 = vld [vmem:[%s3101_s27 + $0x38] sm:$0xff]  ;;  %v474_v40 = vld [vmem:[%s3101_s27 + $0x140] sm:$0xff] }
  0x6d   : > { %730 = vmatmul.bf16.vlgmr.msra.gmra.mxu0 %v562_v43  ;;  %1531 = vmatpush.bf16.msrb.mxu2 %v2596_v52  ;;  %v460_v43 = vld [vmem:[%s3101_s27 + $0xd0] sm:$0xff]  ;;  %v462_v52 = vld [vmem:[%s3101_s27 + $0xe0] sm:$0xff] }
  0x6e   : > { %2643 = vmatpush.bf16.msrb.mxu3 %v700_v44  ;;  %v439_v44 = vld [vmem:[%s3101_s27 + $0x28] sm:$0xff] }
  0x6f   : > { %v563_v45 = vpack.c.bf16 %v439_v44, %v435_v42  ;;  %v464_v44 = vld [vmem:[%s3101_s27 + $0xf0] sm:$0xff] }
  0x71   : > { %819 = vmatmul.bf16.vlgmr.msra.gmra.mxu1 %v563_v45  ;;  %v674_v45 = vld [vmem:[%s4226_s1 + $0x180] sm:$0xff] }
  0x72   : > { %2644 = vmatpush.bf16.msrb.mxu3 %v699_v50  ;;  %v719_v50 = vpack.c.bf16 %v685_v48, %v684_v47  ;;  %v675_v47 = vld [vmem:[%s4226_s1 + $0x188] sm:$0xff] }
  0x73   : > { %v714_v48 = vpack.c.bf16 %v675_v47, %v674_v45  ;;  %v479_v45 = vld [vmem:[%s3101_s27 + $0x168] sm:$0xff] }
  0x76   : > { %2645 = vmatpush.bf16.msrb.mxu3 %v698_v53  ;;  %v2587_v53 = vld [vmem:[#allocation6 + $0xa8] sm:$0xf] }
  0x79   : > { %800 = vmatmul.bf16.gmra.mxu3 %v618_v56  ;;  %v2588_v56 = vor.u32 %v2627_v54, %v2587_v53  ;;  %v459_v53 = vld [vmem:[%s3101_s27 + $0xc8] sm:$0xff]  ;;  %v574_v54 = vpack.c.bf16 %v462_v52, %v458_v51  ;;  %v2617_v51 = vld [vmem:[#allocation6 + $0x64] sm:$0xf] }
  0x7a   : > { %2646 = vmatpush.bf16.msra.mxu3 %v713_v60  ;;  %v2592_v60 = vor.u32 %v2626_v55, %v2589_v57  ;;  %v463_v55 = vld [vmem:[%s3101_s27 + $0xe8] sm:$0xff] }
  0x7b   : > { %1353 = vmatpush.bf16.msrb.mxu0 %v2588_v56  ;;  %v575_v57 = vpack.c.bf16 %v463_v55, %v459_v53  ;;  %v2553_v53 = vld [vmem:[#allocation6 + $0x6c] sm:$0xf0]  ;;  %v3440_v55 = vld [vmem:[%s3364_s13 + $0x68] sm:$0xff] }
  0x7c   : > { %1442 = vmatpush.bf16.msrb.mxu1 %v2592_v60  ;;  %913 = vmatmul.bf16.gmra.mxu2 %v568_v61  ;;  %v2941_v61 = vmov 0   ;;  %4261 = vst [vmem:[#allocation21_spill] sm:$0xff] %v3440_v55 }
  0x7d   : > { %735 = vmatmul.bf16.gmra.mxu0 %v566_v6  ;;  %2744 = vset.pattern.permute.xlu1 %v2941_v61  ;;  %v2565_v6 = vld [vmem:[#allocation6 + $0x84] sm:$0xf0] }
  0x7e   : > { %2647 = vmatpush.bf16.msra.mxu3 %v712_v62  ;;  %v682_v62 = vld [vmem:[%s4226_s1 + $0x1c0] sm:$0xff]  ;;  %2743 = vset.pattern.permute.xlu0 %v2941_v61 }
  0x7f   : > { %v718_v0 = vpack.c.bf16 %v683_v63, %v682_v62  ;;  %1354 = vmatpush.bf16.msrb.mxu0 %v2576_v36  ;;  %1664 = vperm.xlu1 %2744, %v3373_v58   ;;  %v2571_v62 = vld [vmem:[#allocation6 + $0x80] sm:$0xf]  ;;  %v2622_v63 = vld [vmem:[#allocation6 + $0x88] sm:$0xf0]  ;;  %v2619_v36 = vld [vmem:[#allocation6 + $0x70] sm:$0xf0] }
  0x80   : > { %1654 = vperm.xlu0 %2743, %v3376_v59   ;;  %2745 = vset.pattern.permute.xlu2 %v2941_v61 }
  0x82   : > { %2648 = vmatpush.bf16.msra.mxu3 %v711_v5  ;;  %v443_v5 = vld [vmem:[%s3101_s27 + $0x48] sm:$0xff] }
  0x86   : > { %2649 = vmatpush.bf16.msra.mxu3 %v710_v7  ;;  %v447_v7 = vld [vmem:[%s3101_s27 + $0x68] sm:$0xff] }
  0x87   : > { %v567_v8 = vpack.c.bf16 %v447_v7, %v443_v5  ;;  %v3383_v7 = vld [vmem:[%s3364_s13 + $0x18] sm:$0xff] }
  0x88   : > { %4256 = vst [vmem:[#allocation16_spill] sm:$0xff] %v3383_v7  ;;  %1669 = vperm.xlu1 %2744, %v3383_v7  }
  0x89   : > { %805 = vmatmul.bf16.gmra.mxu3 %v622_v1  ;;  %v532_v1 = vld [vmem:[%s3101_s27 + $0x310] sm:$0xff]  ;;  %824 = vmatmul.bf16.gmra.mxu1 %v567_v8  ;;  %v3386_v8 = vld [vmem:[%s3364_s13 + $0x8] sm:$0xff] }
  0x8a   : > { %2650 = vmatpush.bf16.msra.mxu3 %v709_v14  ;;  %v612_v9 = vpack.c.bf16 %v536_v2, %v532_v1  ;;  %v452_v14 = vld [vmem:[%s3101_s27 + $0x90] sm:$0xff]  ;;  %v2563_v2 = vld [vmem:[#allocation6 + $0x78] sm:$0xf]  ;;  %1659 = vperm.xlu0 %2743, %v3386_v8  }
  0x8b   : > { %v572_v17 = vpack.c.bf16 %v456_v15, %v452_v14  ;;  %v2564_v5 = vor.u32 %v2621_v3, %v2563_v2  ;;  %v556_v14 = vld [vmem:[%s3101_s27 + $0x3d0] sm:$0xff]  ;;  %v3458_v2 = vld [vmem:[%s3364_s13 + $0x78] sm:$0xff] }
  0x8c   : > { %v560_v15 = vld [vmem:[%s3101_s27 + $0x3f0] sm:$0xff]  ;;  %4262 = vst [vmem:[#allocation22_spill] sm:$0xff] %v3458_v2 }
  0x8d   : > { %918 = vmatmul.bf16.gmra.mxu2 %v572_v17  ;;  %1355 = vmatpush.bf16.msrb.mxu0 %v2564_v5  ;;  %v470_v17 = vld [vmem:[%s3101_s27 + $0x120] sm:$0xff]  ;;  %v484_v3 = vld [vmem:[%s3101_s27 + $0x190] sm:$0xff] }
  0x8e   : > { %2651 = vmatpush.bf16.msra.mxu3 %v708_v16  ;;  %v678_v16 = vld [vmem:[%s4226_s1 + $0x1a0] sm:$0xff] }
  0x8f   : > { %v716_v21 = vpack.c.bf16 %v679_v18, %v678_v16  ;;  %v466_v16 = vld [vmem:[%s3101_s27 + $0x100] sm:$0xff]  ;;  %v467_v18 = vld [vmem:[%s3101_s27 + $0x108] sm:$0xff] }
  0x92   : > { %2652 = vmatpush.bf16.msra.mxu3 %v707_v23  ;;  %v540_v23 = vld [vmem:[%s3101_s27 + $0x350] sm:$0xff] }
  0x93   : > { %v616_v35 = vpack.c.bf16 %v544_v24, %v540_v23  ;;  %v624_v23 = vpack.c.bf16 %v560_v15, %v556_v14  ;;  %v3401_v24 = vld [vmem:[%s3364_s13 + $0x20] sm:$0xff]  ;;  %v487_v14 = vld [vmem:[%s3101_s27 + $0x1a8] sm:$0xff] }
  0x94   : > { %1674 = vperm.xlu2 %2745, %v3401_v24  }
  0x96   : > { %2653 = vmatpush.bf16.msra.mxu3 %v706_v25  ;;  %v450_v25 = vld [vmem:[%s3101_s27 + $0x80] sm:$0xff] }
  0x99   : > { %879 = vmatmul.bf16.vlgmr.msrb.gmra.mxu3 %v611_v10  ;;  %v680_v10 = vld [vmem:[%s4226_s1 + $0x1b0] sm:$0xff] }
  0x9a   : > { %989 = vmatpush.bf16.msrb.mxu3 %v721_v31  ;;  %v717_v12 = vpack.c.bf16 %v681_v11, %v680_v10  ;;  %v571_v31 = vpack.c.bf16 %v455_v29, %v451_v27  ;;  %v468_v10 = vld [vmem:[%s3101_s27 + $0x110] sm:$0xff] }
  0x9b   : > { %v472_v11 = vld [vmem:[%s3101_s27 + $0x130] sm:$0xff] }
  0x9c   : > { %829 = vmatmul.bf16.gmra.mxu1 %v571_v31  ;;  %v3418_v29 = vld [vmem:[%s3364_s13 + $0x50] sm:$0xff]  ;;  %v3421_v31 = vld [vmem:[%s3364_s13 + $0x48] sm:$0xff] }
  0x9d   : > { %4259 = vst [vmem:[#allocation19_spill] sm:$0xff] %v3418_v29 }
  0x9e   : > { %990 = vmatpush.bf16.msrb.mxu3 %v720_v37  ;;  %v2577_v37 = vld [vmem:[#allocation6 + $0x9c] sm:$0xf0] }
  0x9f   : > { %v2580_v38 = vor.u32 %v2623_v34, %v2577_v37  ;;  %v2559_v34 = vld [vmem:[#allocation6 + $0x68] sm:$0xf] }
  0xa0   : > { %v2560_v37 = vor.u32 %v2619_v36, %v2559_v34  ;;  %v2615_v36 = vld [vmem:[#allocation6 + $0x50] sm:$0xf0] }
  0xa1   : > { %1443 = vmatpush.bf16.msrb.mxu1 %v2580_v38  ;;  %v437_v38 = vld [vmem:[%s3101_s27 + $0x18] sm:$0xff] }
  0xa2   : > { %991 = vmatpush.bf16.msrb.mxu3 %v719_v50  ;;  %v552_v50 = vld [vmem:[%s3101_s27 + $0x3b0] sm:$0xff] }
  0xa3   : > { %v620_v60 = vpack.c.bf16 %v552_v50, %v548_v49  ;;  %v2551_v49 = vld [vmem:[#allocation6 + $0x60] sm:$0xf]  ;;  %v2618_v50 = vld [vmem:[#allocation6 + $0x68] sm:$0xf0] }
  0xa4   : > { %v2552_v52 = vor.u32 %v2618_v50, %v2551_v49  ;;  %v457_v49 = vld [vmem:[%s3101_s27 + $0xb8] sm:$0xff]  ;;  %v490_v50 = vld [vmem:[%s3101_s27 + $0x1c0] sm:$0xff] }
  0xa6   : > { %992 = vmatpush.bf16.msrb.mxu3 %v718_v0  ;;  %v2572_v0 = vor.u32 %v2622_v63, %v2571_v62  ;;  %1356 = vmatpush.bf16.msrb.mxu0 %v2552_v52  ;;  %v3452_v63 = vld [vmem:[%s3364_s13 + $0x58] sm:$0xff]  ;;  %v491_v52 = vld [vmem:[%s3101_s27 + $0x1c8] sm:$0xff] }
  0xa9   : > { %884 = vmatmul.bf16.gmra.mxu3 %v615_v19  ;;  %v2583_v19 = vld [vmem:[#allocation6 + $0x98] sm:$0xf] }
  0xaa   : > { %993 = vmatpush.bf16.msrb.mxu3 %v717_v12  ;;  %v2584_v22 = vor.u32 %v2625_v20, %v2583_v19  ;;  %v580_v12 = vpack.c.bf16 %v472_v11, %v468_v10  ;;  %v578_v19 = vpack.c.bf16 %v470_v17, %v466_v16  ;;  %v471_v20 = vld [vmem:[%s3101_s27 + $0x128] sm:$0xff]  ;;  %v486_v10 = vld [vmem:[%s3101_s27 + $0x1a0] sm:$0xff] }
  0xab   : > { %v483_v11 = vld [vmem:[%s3101_s27 + $0x188] sm:$0xff] }
  0xac   : > { %1532 = vmatpush.bf16.msrb.mxu2 %v2584_v22  ;;  %834 = vmatmul.bf16.gmra.mxu1 %v575_v57  ;;  %v579_v22 = vpack.c.bf16 %v471_v20, %v467_v18  ;;  %v2556_v57 = vor.u32 %v2617_v51, %v2553_v53  ;;  %v587_v16 = vpack.c.bf16 %v487_v14, %v483_v11  ;;  %v3478_v20 = vld [vmem:[%s3364_s13 + $0x98] sm:$0xff]  ;;  %v494_v51 = vld [vmem:[%s3101_s27 + $0x1e0] sm:$0xff] }
  0xad   : > { %v590_v53 = vpack.c.bf16 %v494_v51, %v490_v50  ;;  %v3528_v11 = vld [vmem:[%s3364_s13 + $0xb8] sm:$0xff]  ;;  %v2527_v51 = vld [vmem:[#allocation6 + $0x30] sm:$0xf] }
  0xae   : > { %994 = vmatpush.bf16.msrb.mxu3 %v716_v21  ;;  %4263 = vst [vmem:[#allocation23_spill] sm:$0xff] %v3528_v11  ;;  %v3534_v14 = vld [vmem:[%s3364_s13 + $0xd8] sm:$0xff] }
  0xb0   : > { %1533 = vmatpush.bf16.msrb.mxu2 %v2572_v0  ;;  %v3455_v0 = vld [vmem:[%s3364_s13 + $0x80] sm:$0xff] }
  0xb2   : > { %995 = vmatpush.bf16.msrb.mxu3 %v715_v41  ;;  %v478_v41 = vld [vmem:[%s3101_s27 + $0x160] sm:$0xff] }
  0xb4   : > { %1534 = vmatpush.bf16.msrb.mxu2 %v2560_v37  ;;  %v2614_v37 = vld [vmem:[#allocation6 + $0x4c] sm:$0xf] }
  0xb6   : > { %996 = vmatpush.bf16.msrb.mxu3 %v714_v48  ;;  %v565_v48 = vpack.c.bf16 %v441_v39, %v437_v38  ;;  %v2541_v39 = vld [vmem:[#allocation6 + $0x54] sm:$0xf0] }
  0xb9   : > { %889 = vmatmul.bf16.gmra.mxu3 %v619_v28  ;;  %v570_v28 = vpack.c.bf16 %v454_v26, %v450_v25  ;;  %v3404_v25 = vld [vmem:[%s3364_s13 + $0x38] sm:$0xff]  ;;  %v3407_v26 = vld [vmem:[%s3364_s13 + $0x30] sm:$0xff] }
  0xba   : > { %4257 = vst [vmem:[#allocation17_spill] sm:$0xff] %v3404_v25  ;;  %1689 = vperm.xlu1 %2744, %v3404_v25   ;;  %1684 = vperm.xlu0 %2743, %v3407_v26  }
  0xbb   : > { %740 = vmatmul.bf16.gmra.mxu0 %v570_v28  ;;  %v3415_v28 = vld [vmem:[%s3364_s13 + $0x28] sm:$0xff] }
  0xbc   : > { %839 = vmatmul.bf16.gmra.mxu1 %v579_v22  ;;  %4258 = vst [vmem:[#allocation18_spill] sm:$0xff] %v3415_v28  ;;  %1679 = vperm.xlu2 %2745, %v3415_v28   ;;  %v3481_v22 = vld [vmem:[%s3364_s13 + $0x90] sm:$0xff] }
  0xc2   : > { %1704 = vperm.xlu1 %2744, %v3418_v29   ;;  %1699 = vperm.xlu0 %2743, %v3421_v31  }
  0xc9   : > { %894 = vmatmul.bf16.gmra.mxu3 %v623_v46  ;;  %v576_v46 = vpack.c.bf16 %v464_v44, %v460_v43  ;;  %v475_v43 = vld [vmem:[%s3101_s27 + $0x148] sm:$0xff]  ;;  %v582_v44 = vpack.c.bf16 %v478_v41, %v474_v40  ;;  %v3493_v41 = vld [vmem:[%s3364_s13 + $0xb0] sm:$0xff] }
  0xca   : > { %v583_v47 = vpack.c.bf16 %v479_v45, %v475_v43  ;;  %1719 = vperm.xlu1 %2744, %v3440_v55   ;;  %v3490_v40 = vld [vmem:[%s3364_s13 + $0x88] sm:$0xff]  ;;  %v2544_v43 = vor.u32 %v2614_v37, %v2541_v39  ;;  %v496_v45 = vld [vmem:[%s3101_s27 + $0x1f0] sm:$0xff]  ;;  %v498_v37 = vld [vmem:[%s3101_s27 + $0x200] sm:$0xff] }
  0xcb   : > { %923 = vmatmul.bf16.gmra.mxu2 %v576_v46  ;;  %745 = vmatmul.bf16.gmra.mxu0 %v574_v54  ;;  %v3437_v54 = vld [vmem:[%s3364_s13 + $0x40] sm:$0xff]  ;;  %v499_v39 = vld [vmem:[%s3101_s27 + $0x208] sm:$0xff] }
  0xcc   : > { %844 = vmatmul.bf16.gmra.mxu1 %v583_v47  ;;  %4260 = vst [vmem:[#allocation20_spill] sm:$0xff] %v3437_v54  ;;  %1694 = vperm.xlu2 %2745, %v3437_v54  }
  0xd2   : > { %1734 = vperm.xlu1 %2744, %v3455_v0  }
  0xd4   : > { %1709 = vperm.xlu2 %2745, %v3452_v63  }
  0xd9   : > { %968 = vmatmul.bf16.vlgmr.msra.gmra.mxu3 %v612_v9  ;;  %v2568_v9 = vor.u32 %v2620_v4, %v2565_v6  ;;  %v488_v4 = vld [vmem:[%s3101_s27 + $0x1b0] sm:$0xff]  ;;  %v449_v6 = vld [vmem:[%s3101_s27 + $0x78] sm:$0xff] }
  0xda   : > { %v588_v5 = vpack.c.bf16 %v488_v4, %v484_v3  ;;  %1749 = vperm.xlu1 %2744, %v3478_v20  }
  0xdb   : > { %1444 = vmatpush.bf16.msrb.mxu1 %v2568_v9  ;;  %928 = vmatmul.bf16.gmra.mxu2 %v580_v12  ;;  %v482_v9 = vld [vmem:[%s3101_s27 + $0x180] sm:$0xff] }
  0xdc   : > { %v3324_v13 = vpop.f32.mrf.mxu3  ;;  %750 = vmatmul.bf16.gmra.mxu0 %v578_v19  ;;  %v586_v12 = vpack.c.bf16 %v486_v10, %v482_v9  ;;  %v3475_v19 = vld [vmem:[%s3364_s13 + $0x70] sm:$0xff]  ;;  %849 = vmatmul.bf16.gmra.mxu1 %v587_v16  ;;  %v3519_v9 = vld [vmem:[%s3364_s13 + $0xc0] sm:$0xff] }
  0xdd   : > { %1724 = vperm.xlu2 %2745, %v3475_v19   ;;  %v504_v16 = vld [vmem:[%s3101_s27 + $0x230] sm:$0xff] }
  0xdf   : > { %1445 = vmatpush.bf16.msrb.mxu1 %v2556_v57  ;;  %v495_v57 = vld [vmem:[%s3101_s27 + $0x1e8] sm:$0xff] }
  0xe0   : > { %v591_v3 = vpack.c.bf16 %v495_v57, %v491_v52  ;;  %v2612_v52 = vld [vmem:[#allocation6 + $0x38] sm:$0xf0] }
  0xe1   : > { %v2528_v57 = vor.u32 %v2612_v52, %v2527_v51 }
  0xe2   : > { %1764 = vperm.xlu1 %2744, %v3493_v41  }
  0xe3   : > { %1446 = vmatpush.bf16.msrb.mxu1 %v2544_v43 }
  0xe4   : > { %v3341_v30 = vpop.f32.mrf.mxu3 }
  0xe5   : > { %1739 = vperm.xlu2 %2745, %v3490_v40  }
  0xe9   : > { %973 = vmatmul.bf16.gmra.mxu3 %v616_v35  ;;  %v584_v35 = vpack.c.bf16 %v480_v33, %v476_v32 }
  0xeb   : > { %933 = vmatmul.bf16.gmra.mxu2 %v584_v35  ;;  %v2539_v35 = vld [vmem:[#allocation6 + $0x48] sm:$0xf] }
  0xec   : > { %v3349_v42 = vpop.f32.mrf.mxu3  ;;  %755 = vmatmul.bf16.gmra.mxu0 %v582_v44  ;;  %v2540_v38 = vor.u32 %v2615_v36, %v2539_v35  ;;  %v492_v44 = vld [vmem:[%s3101_s27 + $0x1d0] sm:$0xff]  ;;  %854 = vmatmul.bf16.gmra.mxu1 %v591_v3  ;;  %v3543_v35 = vpop.f32.mrf.mxu0 }
  0xed   : > { %v592_v47 = vpack.c.bf16 %v496_v45, %v492_v44  ;;  %v503_v45 = vld [vmem:[%s3101_s27 + $0x228] sm:$0xff]  ;;  %v3557_v3 = vld [vmem:[%s3364_s13 + $0xd0] sm:$0xff] }
  0xee   : > { %1357 = vmatpush.bf16.msrb.mxu0 %v2540_v38  ;;  %v502_v38 = vld [vmem:[%s3101_s27 + $0x220] sm:$0xff]  ;;  %v3550_v43 = vpop.f32.mrf.mxu1  ;;  %4265 = vst [vmem:[#allocation25_spill] sm:$0xff] %v3557_v3 }
  0xef   : > { %v3545_v36 = vpop.f32.mrf.mxu2  ;;  %v594_v44 = vpack.c.bf16 %v502_v38, %v498_v37  ;;  %v2942_v38 = vmov 1  }
  0xf2   : > { %1358 = vmatpush.bf16.msrb.mxu0 %v2528_v57 }
  0xf4   : > { %v3370_v56 = vpop.f32.mrf.mxu3 }
  0xf9   : > { %978 = vmatmul.bf16.gmra.mxu3 %v620_v60  ;;  %v3445_v60 = vld [vmem:[%s3364_s13 + $0x60] sm:$0xff] }
  0xfa   : > { %1714 = vperm.xlu0 %2743, %v3445_v60  }
  0xfb   : > { %938 = vmatmul.bf16.gmra.mxu2 %v588_v5 }
  0xfc   : > { %v3380_v1 = vpop.f32.mrf.mxu3  ;;  %760 = vmatmul.bf16.gmra.mxu0 %v586_v12  ;;  %v3531_v12 = vld [vmem:[%s3364_s13 + $0xe0] sm:$0xff] }
  0xfd   : > { %4264 = vst [vmem:[#allocation24_spill] sm:$0xff] %v3531_v12 }
 0x102   : > { %1729 = vperm.xlu0 %2743, %v3458_v2  }
 0x104   : > { %v3398_v21 = vpop.f32.mrf.mxu3 }
 0x109   : > { %983 = vmatmul.bf16.gmra.mxu3 %v624_v23  ;;  %v2616_v23 = vld [vmem:[#allocation6 + $0x58] sm:$0xf0] }
 0x10a   : > { %1744 = vperm.xlu0 %2743, %v3481_v22  }
 0x10b   : > { %943 = vmatmul.bf16.gmra.mxu2 %v592_v47 }
 0x10c   : > { %v3412_v27 = vpop.f32.mrf.mxu3  ;;  %765 = vmatmul.bf16.gmra.mxu0 %v590_v53  ;;  %v2611_v53 = vld [vmem:[#allocation6 + $0x34] sm:$0xf] }
 0x114   : > { %v3434_v46 = vpop.f32.mrf.mxu3 }
 0x119   : > { %997 = vmatmul.bf16.vlgmr.msrb.gmra.mxu3 %v565_v48  ;;  %v453_v48 = vld [vmem:[%s3101_s27 + $0x98] sm:$0xff] }
 0x11a   : > { %v573_v5 = vpack.c.bf16 %v457_v49, %v453_v48  ;;  %v595_v48 = vpack.c.bf16 %v503_v45, %v499_v39  ;;  %v469_v39 = vld [vmem:[%s3101_s27 + $0x118] sm:$0xff]  ;;  %v506_v45 = vld [vmem:[%s3101_s27 + $0x240] sm:$0xff] }
 0x11c   : > { %v880_v61 = vpop.f32.mrf.mxu3  ;;  %770 = vmatmul.bf16.gmra.mxu0 %v594_v44  ;;  %859 = vmatmul.bf16.gmra.mxu1 %v595_v48  ;;  %v473_v44 = vld [vmem:[%s3101_s27 + $0x138] sm:$0xff]  ;;  %v507_v48 = vld [vmem:[%s3101_s27 + $0x248] sm:$0xff] }
 0x11d   : > { %v3449_v62 = vadd.f32 %v880_v61, %v3324_v13  ;;  %v445_v13 = vld [vmem:[%s3101_s27 + $0x58] sm:$0xff] }
 0x11e   : > { %v569_v18 = vpack.c.bf16 %v449_v6, %v445_v13  ;;  %v3513_v13 = vld [vmem:[%s3364_s13 + $0xa0] sm:$0xff]  ;;  %v3516_v6 = vld [vmem:[%s3364_s13 + $0xc8] sm:$0xff] }
 0x11f   : > { %1754 = vperm.xlu2 %2745, %v3513_v13   ;;  %1779 = vperm.xlu1 %2744, %v3516_v6  }
 0x124   : > { %v882_v15 = vpop.f32.mrf.mxu3 }
 0x125   : > { %v3472_v17 = vadd.f32 %v882_v15, %v3341_v30  ;;  %v2547_v30 = vld [vmem:[#allocation6 + $0x50] sm:$0xf] }
 0x126   : > { %v2548_v32 = vor.u32 %v2616_v23, %v2547_v30  ;;  %v500_v15 = vld [vmem:[%s3101_s27 + $0x210] sm:$0xff] }
 0x127   : > { %1769 = vperm.xlu2 %2745, %v3528_v11   ;;  %1794 = vperm.xlu1 %2744, %v3531_v12   ;;  %v596_v30 = vpack.c.bf16 %v504_v16, %v500_v15  ;;  %v3568_v15 = vpop.f32.mrf.mxu0  ;;  %v3570_v16 = vpop.f32.mrf.mxu2 }
 0x128   : > { %1535 = vmatpush.bf16.msrb.mxu2 %v2548_v32  ;;  %v461_v32 = vld [vmem:[%s3101_s27 + $0xd8] sm:$0xff] }
 0x129   : > { %1002 = vmatmul.bf16.gmra.mxu3 %v569_v18  ;;  %v2535_v18 = vld [vmem:[#allocation6 + $0x38] sm:$0xf]  ;;  %948 = vmatmul.bf16.gmra.mxu2 %v596_v30 }
 0x12c   : > { %v885_v33 = vpop.f32.mrf.mxu3 }
 0x12d   : > { %v3487_v34 = vadd.f32 %v885_v33, %v3349_v42  ;;  %v3498_v42 = vld [vmem:[%s3364_s13 + $0xa8] sm:$0xff]  ;;  %v465_v33 = vld [vmem:[%s3101_s27 + $0xf8] sm:$0xff] }
 0x12e   : > { %1759 = vperm.xlu0 %2743, %v3498_v42   ;;  %v577_v50 = vpack.c.bf16 %v465_v33, %v461_v32  ;;  %v508_v32 = vld [vmem:[%s3101_s27 + $0x250] sm:$0xff] }
 0x12f   : > { %1784 = vperm.xlu2 %2745, %v3557_v3   ;;  %v512_v33 = vld [vmem:[%s3101_s27 + $0x270] sm:$0xff]  ;;  %v3594_v51 = vpop.f32.mrf.mxu2 }
 0x130   : > { %v600_v37 = vpack.c.bf16 %v512_v33, %v508_v32  ;;  %v2523_v32 = vld [vmem:[#allocation6 + $0x20] sm:$0xf]  ;;  %v2610_v33 = vld [vmem:[#allocation6 + $0x28] sm:$0xf0] }
 0x134   : > { %v887_v61 = vpop.f32.mrf.mxu3 }
 0x135   : > { %v3510_v4 = vadd.f32 %v887_v61, %v3370_v56  ;;  %v2529_v61 = vld [vmem:[#allocation6 + $0x3c] sm:$0xf0] }
 0x136   : > { %1774 = vperm.xlu0 %2743, %v3519_v9  }
 0x139   : > { %1007 = vmatmul.bf16.gmra.mxu3 %v573_v5  ;;  %v3560_v5 = vld [vmem:[%s3364_s13 + $0xf8] sm:$0xff]  ;;  %953 = vmatmul.bf16.gmra.mxu2 %v600_v37  ;;  %v2524_v37 = vor.u32 %v2610_v33, %v2523_v32 }
 0x13a   : > { %4266 = vst [vmem:[#allocation26_spill] sm:$0xff] %v3560_v5  ;;  %1809 = vperm.xlu1 %2744, %v3560_v5  }
 0x13c   : > { %v890_v56 = vpop.f32.mrf.mxu3 }
 0x13d   : > { %v3525_v10 = vadd.f32 %v890_v56, %v3380_v1  ;;  %v2613_v1 = vld [vmem:[#allocation6 + $0x40] sm:$0xf0]  ;;  %v2532_v56 = vor.u32 %v2611_v53, %v2529_v61  ;;  %v511_v53 = vld [vmem:[%s3101_s27 + $0x268] sm:$0xff] }
 0x13e   : > { %1789 = vperm.xlu0 %2743, %v3534_v14   ;;  %v2536_v23 = vor.u32 %v2613_v1, %v2535_v18  ;;  %v3572_v18 = vpop.f32.mrf.mxu1  ;;  %v599_v61 = vpack.c.bf16 %v511_v53, %v507_v48  ;;  %v2609_v48 = vld [vmem:[#allocation6 + $0x20] sm:$0xf0] }
 0x13f   : > { %1447 = vmatpush.bf16.msrb.mxu1 %v2532_v56 }
 0x140   : > { %1536 = vmatpush.bf16.msrb.mxu2 %v2536_v23  ;;  %v3578_v23 = vld [vmem:[%s3364_s13 + $0xe8] sm:$0xff]  ;;  %864 = vmatmul.bf16.gmra.mxu1 %v599_v61  ;;  %v516_v61 = vld [vmem:[%s3101_s27 + $0x290] sm:$0xff] }
 0x141   : > { %1799 = vperm.xlu2 %2745, %v3578_v23  }
 0x142   : > { %2748 = vset.pattern.permute.xlu1 %v2942_v38 }
 0x143   : > { %1853 = vperm.xlu1 %2748, %v3373_v58  }
 0x144   : > { %v892_v47 = vpop.f32.mrf.mxu3  ;;  %1537 = vmatpush.bf16.msrb.mxu2 %v2524_v37  ;;  %v3615_v37 = vpop.permute.xlu2 %1674 }
 0x145   : > { %v3554_v49 = vadd.f32 %v892_v47, %v3398_v21  ;;  %v3565_v21 = vld [vmem:[%s3364_s13 + $0xf0] sm:$0xff]  ;;  %v510_v47 = vld [vmem:[%s3101_s27 + $0x260] sm:$0xff]  ;;  %4268 = vst [vmem:[#allocation28_spill] sm:$0xff] %v3615_v37 }
 0x146   : > { %1804 = vperm.xlu0 %2743, %v3565_v21   ;;  %v598_v52 = vpack.c.bf16 %v510_v47, %v506_v45  ;;  %v2515_v47 = vld [vmem:[#allocation6 + $0x18] sm:$0xf] }
 0x147   : > { %v2516_v53 = vor.u32 %v2609_v48, %v2515_v47  ;;  %v514_v48 = vld [vmem:[%s3101_s27 + $0x280] sm:$0xff] }
 0x148   : > { %775 = vmatmul.bf16.gmra.mxu0 %v598_v52  ;;  %v2608_v52 = vld [vmem:[#allocation6 + $0x1c] sm:$0xf] }
 0x149   : > { %1012 = vmatmul.bf16.gmra.mxu3 %v577_v50  ;;  %v3592_v50 = vpop.f32.mrf.mxu1  ;;  %2746 = vset.pattern.permute.xlu2 %v2942_v38 }
 0x14a   : > { %1845 = vperm.xlu2 %2746, %v3376_v59   ;;  %1359 = vmatpush.bf16.msrb.mxu0 %v2516_v53 }
 0x14b   : > { %1861 = vperm.xlu1 %2748, %v3401_v24  }
 0x14c   : > { %v895_v30 = vpop.f32.mrf.mxu3 }
 0x14d   : > { %v3575_v1 = vadd.f32 %v895_v30, %v3412_v27  ;;  %v3587_v27 = vpop.f32.mrf.mxu0  ;;  %v581_v30 = vpack.c.bf16 %v473_v44, %v469_v39 }
 0x14e   : > { %2747 = vset.pattern.permute.xlu0 %v2942_v38  ;;  %v3607_v38 = vpop.f32.mrf.mxu2 }
 0x14f   : > { %1849 = vperm.xlu0 %2747, %v3386_v8  }
 0x152   : > { %1857 = vperm.xlu2 %2746, %v3383_v7  }
 0x153   : > { %1873 = vperm.xlu1 %2748, %v3404_v25  }
 0x154   : > { %v897_v57 = vpop.f32.mrf.mxu3 }
 0x155   : > { %v3598_v56 = vadd.f32 %v897_v57, %v3434_v46  ;;  %v3603_v45 = vpop.f32.mrf.mxu0  ;;  %v3605_v46 = vpop.f32.mrf.mxu1  ;;  %v2517_v57 = vld [vmem:[#allocation6 + $0x24] sm:$0xf0] }
 0x156   : > { %v2520_v32 = vor.u32 %v2608_v52, %v2517_v57  ;;  %v515_v52 = vld [vmem:[%s3101_s27 + $0x288] sm:$0xff]  ;;  %v3632_v7 = vpop.f32.mrf.mxu2 }
 0x157   : > { %1869 = vperm.xlu0 %2747, %v3407_v26   ;;  %4270 = vst [vmem:[#allocation30_spill] sm:$0xff] %v3632_v7  ;;  %v2505_v7 = vld [vmem:[#allocation6 + $0xc] sm:$0xf0] }
 0x158   : > { %1448 = vmatpush.bf16.msrb.mxu1 %v2520_v32 }
 0x159   : > { %1017 = vmatmul.bf16.gmra.mxu3 %v581_v30  ;;  %v520_v30 = vld [vmem:[%s3101_s27 + $0x2b0] sm:$0xff] }
 0x15a   : > { %v604_v33 = vpack.c.bf16 %v520_v30, %v516_v61  ;;  %v519_v61 = vld [vmem:[%s3101_s27 + $0x2a8] sm:$0xff]  ;;  %1865 = vperm.xlu2 %2746, %v3415_v28  }
 0x15b   : > { %v603_v25 = vpack.c.bf16 %v519_v61, %v515_v52  ;;  %1885 = vperm.xlu1 %2748, %v3418_v29   ;;  %v524_v52 = vld [vmem:[%s3101_s27 + $0x2d0] sm:$0xff]  ;;  %v2511_v61 = vld [vmem:[#allocation6 + $0x8] sm:$0xf] }
 0x15c   : > { %v969_v39 = vpop.f32.mrf.mxu3  ;;  %958 = vmatmul.bf16.gmra.mxu2 %v604_v33  ;;  %v3636_v33 = vpop.permute.xlu2 %1679  ;;  %v527_v28 = vld [vmem:[%s3101_s27 + $0x2e8] sm:$0xff] }
 0x15d   : > { %v3610_v44 = vadd.f32 %v969_v39, %v3449_v62  ;;  %v477_v62 = vld [vmem:[%s3101_s27 + $0x158] sm:$0xff]  ;;  %v3621_v47 = vpop.f32.mrf.mxu0  ;;  %v3626_v57 = vpop.f32.mrf.mxu1  ;;  %869 = vmatmul.bf16.gmra.mxu1 %v603_v25  ;;  %4271 = vst [vmem:[#allocation31_spill] sm:$0xff] %v3636_v33 }
 0x15e   : > { %v481_v39 = vld [vmem:[%s3101_s27 + $0x178] sm:$0xff]  ;;  %v3652_v33 = vpop.f32.mrf.mxu2 }
 0x15f   : > { %4267 = vst [vmem:[#allocation27_spill] sm:$0xff] %v3610_v44  ;;  %1881 = vperm.xlu0 %2747, %v3421_v31   ;;  %v518_v44 = vld [vmem:[%s3101_s27 + $0x2a0] sm:$0xff]  ;;  %v585_v32 = vpack.c.bf16 %v481_v39, %v477_v62  ;;  %v3643_v62 = vpop.permute.xlu0 %1654 }
 0x160   : > { %v602_v53 = vpack.c.bf16 %v518_v44, %v514_v48  ;;  %v3638_v44 = vpop.permute.xlu1 %1664  ;;  %4273 = vst [vmem:[#allocation33_spill] sm:$0xff] %v3643_v62  ;;  %v489_v62 = vld [vmem:[%s3101_s27 + $0x1b8] sm:$0xff] }
 0x161   : > { %4272 = vst [vmem:[#allocation32_spill] sm:$0xff] %v3638_v44  ;;  %v485_v44 = vld [vmem:[%s3101_s27 + $0x198] sm:$0xff] }
 0x162   : > { %780 = vmatmul.bf16.gmra.mxu0 %v602_v53  ;;  %v528_v53 = vld [vmem:[%s3101_s27 + $0x2f0] sm:$0xff]  ;;  %4276 = vst [vmem:[#allocation36_spill] sm:$0xff] %v3652_v33  ;;  %1877 = vperm.xlu2 %2746, %v3437_v54  }
 0x163   : > { %1897 = vperm.xlu1 %2748, %v3440_v55  }
 0x164   : > { %v971_v30 = vpop.f32.mrf.mxu3 }
 0x165   : > { %v3630_v37 = vadd.f32 %v971_v30, %v3472_v17  ;;  %v3641_v17 = vpop.f32.mrf.mxu0  ;;  %v3645_v39 = vpop.f32.mrf.mxu1  ;;  %v608_v30 = vpack.c.bf16 %v528_v53, %v524_v52  ;;  %v522_v53 = vld [vmem:[%s3101_s27 + $0x2c0] sm:$0xff] }
 0x166   : > { %4274 = vst [vmem:[#allocation34_spill] sm:$0xff] %v3645_v39 }
 0x167   : > { %4269 = vst [vmem:[#allocation29_spill] sm:$0xff] %v3630_v37  ;;  %1893 = vperm.xlu0 %2747, %v3445_v60   ;;  %v3663_v52 = vpop.permute.xlu0 %1659 }
 0x168   : > { %4279 = vst [vmem:[#allocation39_spill] sm:$0xff] %v3663_v52 }
 0x169   : > { %1022 = vmatmul.bf16.gmra.mxu3 %v585_v32  ;;  %v2607_v32 = vld [vmem:[#allocation6 + $0x10] sm:$0xf0] }
 0x16a   : > { %v2512_v37 = vor.u32 %v2607_v32, %v2511_v61  ;;  %v526_v61 = vld [vmem:[%s3101_s27 + $0x2e0] sm:$0xff]  ;;  %v523_v32 = vld [vmem:[%s3101_s27 + $0x2c8] sm:$0xff]  ;;  %1889 = vperm.xlu2 %2746, %v3452_v63  }
 0x16b   : > { %v607_v33 = vpack.c.bf16 %v527_v28, %v523_v32  ;;  %1909 = vperm.xlu1 %2748, %v3455_v0  }
 0x16c   : > { %v974_v25 = vpop.f32.mrf.mxu3  ;;  %1538 = vmatpush.bf16.msrb.mxu2 %v2512_v37 }
 0x16d   : > { %v3648_v48 = vadd.f32 %v974_v25, %v3487_v34  ;;  %v3658_v34 = vpop.permute.xlu2 %1694  ;;  %v3660_v25 = vpop.permute.xlu1 %1669  ;;  %963 = vmatmul.bf16.gmra.mxu2 %v608_v30  ;;  %v2606_v30 = vld [vmem:[#allocation6 + $0x8] sm:$0xf0]  ;;  %874 = vmatmul.bf16.gmra.mxu1 %v607_v33 }
 0x16e   : > { %4277 = vst [vmem:[#allocation37_spill] sm:$0xff] %v3658_v34  ;;  %v3669_v29 = vpop.f32.mrf.mxu0  ;;  %v589_v34 = vpack.c.bf16 %v489_v62, %v485_v44  ;;  %v3674_v54 = vpop.f32.mrf.mxu1 }
 0x16f   : > { %4275 = vst [vmem:[#allocation35_spill] sm:$0xff] %v3648_v48  ;;  %1905 = vperm.xlu0 %2747, %v3458_v2   ;;  %v606_v48 = vpack.c.bf16 %v526_v61, %v522_v53  ;;  %v2605_v2 = vld [vmem:[#allocation6 + $0x4] sm:$0xf]  ;;  %v3685_v33 = vpop.f32.mrf.mxu2 }
 0x170   : > { %4278 = vst [vmem:[#allocation38_spill] sm:$0xff] %v3660_v25  ;;  %v2503_v25 = vld [vmem:[#allocation6] sm:$0xf]  ;;  %v2508_v39 = vor.u32 %v2605_v2, %v2505_v7 }
 0x171   : > { %v2504_v52 = vor.u32 %v2606_v30, %v2503_v25  ;;  %v497_v25 = vld [vmem:[%s3101_s27 + $0x1f8] sm:$0xff] }
 0x172   : > { %785 = vmatmul.bf16.gmra.mxu0 %v606_v48  ;;  %1449 = vmatpush.bf16.msrb.mxu1 %v2508_v39 }
 0x173   : > { %1360 = vmatpush.bf16.msrb.mxu0 %v2504_v52  ;;  %1921 = vperm.xlu1 %2748, %v3478_v20  }
 0x174   : > { %v976_v55 = vpop.f32.mrf.mxu3  ;;  %1901 = vperm.xlu2 %2746, %v3475_v19  }
 0x175   : > { %v3672_v37 = vadd.f32 %v976_v55, %v3510_v4  ;;  %v3677_v28 = vpop.permute.xlu2 %1709  ;;  %v3679_v55 = vpop.permute.xlu1 %1689 }
 0x176   : > { %4281 = vst [vmem:[#allocation41_spill] sm:$0xff] %v3677_v28  ;;  %v3683_v4 = vpop.permute.xlu0 %1684  ;;  %v3690_v44 = vpop.f32.mrf.mxu0 }
 0x177   : > { %4280 = vst [vmem:[#allocation40_spill] sm:$0xff] %v3672_v37  ;;  %1917 = vperm.xlu0 %2747, %v3481_v22   ;;  %v3692_v62 = vpop.f32.mrf.mxu1  ;;  %v3708_v32 = vpop.f32.mrf.mxu2 }
 0x178   : > { %4282 = vst [vmem:[#allocation42_spill] sm:$0xff] %v3679_v55 }
 0x179   : > { %1027 = vmatmul.bf16.gmra.mxu3 %v589_v34  ;;  %4283 = vst [vmem:[#allocation43_spill] sm:$0xff] %v3683_v4  ;;  %v493_v34 = vld [vmem:[%s3101_s27 + $0x1d8] sm:$0xff] }
 0x17a   : > { %v593_v61 = vpack.c.bf16 %v497_v25, %v493_v34 }
 0x17b   : > { %1933 = vperm.xlu1 %2748, %v3493_v41  }
 0x17c   : > { %v979_v7 = vpop.f32.mrf.mxu3  ;;  %1913 = vperm.xlu2 %2746, %v3490_v40  }
 0x17d   : > { %v3688_v2 = vadd.f32 %v979_v7, %v3525_v10  ;;  %v3695_v39 = vpop.permute.xlu2 %1724  ;;  %v3697_v48 = vpop.permute.xlu1 %1704 }
 0x17e   : > { %4285 = vst [vmem:[#allocation45_spill] sm:$0xff] %v3695_v39  ;;  %v3703_v52 = vpop.permute.xlu0 %1699  ;;  %v3710_v30 = vpop.f32.mrf.mxu0 }
 0x17f   : > { %4284 = vst [vmem:[#allocation44_spill] sm:$0xff] %v3688_v2  ;;  %1929 = vperm.xlu0 %2747, %v3498_v42   ;;  %v3713_v7 = vpop.f32.mrf.mxu1  ;;  %v505_v2 = vld [vmem:[%s3101_s27 + $0x238] sm:$0xff] }
 0x180   : > { %4286 = vst [vmem:[#allocation46_spill] sm:$0xff] %v3697_v48 }
 0x181   : > { %4287 = vst [vmem:[#allocation47_spill] sm:$0xff] %v3703_v52 }
 0x183   : > { %1945 = vperm.xlu1 %2748, %v3516_v6  }
 0x184   : > { %v981_v10 = vpop.f32.mrf.mxu3  ;;  %1925 = vperm.xlu2 %2746, %v3513_v13  }
 0x185   : > { %v3706_v53 = vadd.f32 %v981_v10, %v3554_v49  ;;  %v3717_v39 = vpop.permute.xlu2 %1739  ;;  %v3719_v49 = vpop.permute.xlu1 %1719 }
 0x186   : > { %4289 = vst [vmem:[#allocation49_spill] sm:$0xff] %v3717_v39  ;;  %v3721_v34 = vpop.permute.xlu0 %1714  ;;  %v3731_v28 = vpop.f32.mrf.mxu0 }
 0x187   : > { %4288 = vst [vmem:[#allocation48_spill] sm:$0xff] %v3706_v53  ;;  %1941 = vperm.xlu0 %2747, %v3519_v9   ;;  %v3726_v53 = vpop.f32.mrf.mxu2  ;;  %v3735_v39 = vpop.f32.mrf.mxu1 }
 0x188   : > { %4290 = vst [vmem:[#allocation50_spill] sm:$0xff] %v3719_v49 }
 0x189   : > { %1032 = vmatmul.bf16.gmra.mxu3 %v593_v61  ;;  %4291 = vst [vmem:[#allocation51_spill] sm:$0xff] %v3721_v34  ;;  %v501_v61 = vld [vmem:[%s3101_s27 + $0x218] sm:$0xff] }
 0x18b   : > { %1957 = vperm.xlu1 %2748, %v3531_v12  }
 0x18c   : > { %v984_v10 = vpop.f32.mrf.mxu3  ;;  %1937 = vperm.xlu2 %2746, %v3528_v11  }
 0x18d   : > { %v3724_v25 = vadd.f32 %v984_v10, %v3575_v1  ;;  %v3737_v49 = vpop.permute.xlu1 %1734  ;;  %v597_v10 = vpack.c.bf16 %v505_v2, %v501_v61  ;;  %v823_v61 = vadd.f32 %v3572_v18, %v3568_v15 }
 0x18e   : > { %4293 = vst [vmem:[#allocation53_spill] sm:$0xff] %v3737_v49  ;;  %v3739_v48 = vpop.permute.xlu0 %1729  ;;  %v3753_v52 = vpop.f32.mrf.mxu0 }
 0x18f   : > { %4292 = vst [vmem:[#allocation52_spill] sm:$0xff] %v3724_v25  ;;  %1953 = vperm.xlu0 %2747, %v3534_v14   ;;  %v3744_v25 = vpop.permute.xlu2 %1754  ;;  %v3747_v37 = vpop.f32.mrf.mxu2 }
 0x190   : > { %4294 = vst [vmem:[#allocation54_spill] sm:$0xff] %v3739_v48 }
 0x191   : > { %4296 = vst [vmem:[#allocation56_spill] sm:$0xff] %v3744_v25  ;;  %v509_v25 = vld [vmem:[%s3101_s27 + $0x258] sm:$0xff] }
 0x193   : > { %1969 = vperm.xlu1 %2748, %v3560_v5  }
 0x194   : > { %v986_v34 = vpop.f32.mrf.mxu3  ;;  %1949 = vperm.xlu2 %2746, %v3557_v3  }
 0x195   : > { %v3742_v1 = vadd.f32 %v986_v34, %v3598_v56  ;;  %v3751_v49 = vpop.permute.xlu1 %1749  ;;  %v3755_v56 = vpop.f32.mrf.mxu1  ;;  %v821_v34 = vadd.f32 %v3550_v43, %v3543_v35 }
 0x196   : > { %4297 = vst [vmem:[#allocation57_spill] sm:$0xff] %v3751_v49  ;;  %v3757_v2 = vpop.permute.xlu0 %1744  ;;  %v2943_v49 = vmov 2   ;;  %v3776_v5 = vpop.f32.mrf.mxu0 }
 0x197   : > { %4295 = vst [vmem:[#allocation55_spill] sm:$0xff] %v3742_v1  ;;  %1965 = vperm.xlu0 %2747, %v3565_v21   ;;  %v513_v1 = vld [vmem:[%s3101_s27 + $0x278] sm:$0xff]  ;;  %v910_v55 = vadd.f32 %v3545_v36, %v821_v34  ;;  %v3771_v4 = vpop.f32.mrf.mxu2 }
 0x198   : > { %4298 = vst [vmem:[#allocation58_spill] sm:$0xff] %v3757_v2  ;;  %v912_v2 = vadd.f32 %v3570_v16, %v823_v61  ;;  %v601_v18 = vpack.c.bf16 %v513_v1, %v509_v25  ;;  %v521_v34 = vld [vmem:[%s3101_s27 + $0x2b8] sm:$0xff] }
 0x199   : > { %1037 = vmatmul.bf16.gmra.mxu3 %v597_v10  ;;  %v3763_v10 = vpop.permute.xlu2 %1769 }
 0x19a   : > { %4299 = vst [vmem:[#allocation59_spill] sm:$0xff] %v3763_v10 }
 0x19b   : > { %2751 = vset.pattern.permute.xlu1 %v2943_v49 }
 0x19c   : > { %v998_v48 = vpop.f32.mrf.mxu3  ;;  %1961 = vperm.xlu2 %2746, %v3578_v23   ;;  %2045 = vperm.xlu1 %2751, %v3373_v58   ;;  %v517_v58 = vld [vmem:[%s3101_s27 + $0x298] sm:$0xff] }
 0x19d   : > { %v999_v43 = vadd.f32 %v998_v48, %v910_v55  ;;  %v3774_v10 = vpop.permute.xlu1 %1764  ;;  %v3778_v3 = vpop.f32.mrf.mxu1  ;;  %v826_v55 = vadd.f32 %v3592_v50, %v3587_v27  ;;  %v828_v48 = vadd.f32 %v3605_v46, %v3603_v45  ;;  %v605_v46 = vpack.c.bf16 %v521_v34, %v517_v58 }
 0x19e   : > { %v3795_v1 = vpop.f32.mrf.mxu0 }
 0x19f   : > { %2750 = vset.pattern.permute.xlu0 %v2943_v49  ;;  %v3787_v16 = vpop.f32.mrf.mxu2  ;;  %v917_v61 = vadd.f32 %v3607_v38, %v828_v48  ;;  %v4306_v48 = vld [vmem:[#allocation34_spill] sm:$0xff] }
 0x1a0   : > { %2041 = vperm.xlu0 %2750, %v3386_v8   ;;  %v3780_v12 = vpop.permute.xlu0 %1759  ;;  %v833_v58 = vadd.f32 %v4306_v48, %v3641_v17 }
 0x1a1   : > { %v3782_v36 = vpop.permute.xlu2 %1784 }
 0x1a2   : > { %4300 = vst [vmem:[#allocation60_spill] sm:$0xff] %v3782_v36 }
 0x1a4   : > { %v1000_v35 = vpop.f32.mrf.mxu3  ;;  %2749 = vset.pattern.permute.xlu2 %v2943_v49  ;;  %2053 = vperm.xlu1 %2751, %v3401_v24  }
 0x1a5   : > { %v1001_v15 = vadd.f32 %v1000_v35, %v912_v2  ;;  %v3793_v25 = vpop.permute.xlu1 %1779  ;;  %2037 = vperm.xlu2 %2749, %v3376_v59  }
 0x1a6   : > { %v3814_v24 = vpop.f32.mrf.mxu0 }
 0x1a7   : > { %v1177_v11 = vpack.c.bf16 %v1001_v15, %v999_v43  ;;  %v3810_v15 = vpop.f32.mrf.mxu2 }
 0x1a8   : > { %2061 = vperm.xlu0 %2750, %v3407_v26   ;;  %v3799_v2 = vpop.permute.xlu0 %1774  ;;  %v915_v26 = vadd.f32 %v3594_v51, %v826_v55  ;;  %v831_v55 = vadd.f32 %v3626_v57, %v3621_v47  ;;  %v4312_v47 = vld [vmem:[#allocation22_spill] sm:$0xff] }
 0x1a9   : > { %1042 = vmatmul.bf16.gmra.mxu3 %v601_v18  ;;  %1361 = vmatmul.bf16.vlgmr.msrb.gmra.mxu0 %v1177_v11  ;;  %v3805_v35 = vpop.permute.xlu2 %1799  ;;  %v4305_v18 = vld [vmem:[#allocation16_spill] sm:$0xff] }
 0x1aa   : > { %1450 = vmatmul.bf16.vlgmr.msrb.gmra.mxu1 %v1177_v11  ;;  %1539 = vmatmul.bf16.vlgmr.msrb.gmra.mxu2 %v1177_v11  ;;  %v3797_v11 = vpop.f32.mrf.mxu1  ;;  %4301 = vst [vmem:[#allocation61_spill] sm:$0xff] %v3805_v35  ;;  %v4311_v35 = vld [vmem:[#allocation18_spill] sm:$0xff] }
 0x1ac   : > { %v1003_v8 = vpop.f32.mrf.mxu3 }
 0x1ad   : > { %v1004_v50 = vadd.f32 %v1003_v8, %v915_v26  ;;  %v3812_v51 = vpop.permute.xlu1 %1794  ;;  %2049 = vperm.xlu2 %2749, %v4305_v18   ;;  %v525_v26 = vld [vmem:[%s3101_s27 + $0x2d8] sm:$0xff] }
 0x1ae   : > { %4302 = vst [vmem:[#allocation62_spill] sm:$0xff] %v3812_v51  ;;  %v3838_v18 = vpop.f32.mrf.mxu0 }
 0x1af   : > { %v3829_v34 = vpop.f32.mrf.mxu2 }
 0x1b0   : > { %2073 = vperm.xlu0 %2750, %v3421_v31   ;;  %v3818_v59 = vpop.permute.xlu0 %1789  ;;  %v4304_v31 = vld [vmem:[#allocation17_spill] sm:$0xff] }
 0x1b1   : > { %4303 = vst [vmem:[#allocation63_spill] sm:$0xff] %v3818_v59  ;;  %2065 = vperm.xlu1 %2751, %v4304_v31   ;;  %v3823_v8 = vpop.permute.xlu2 %1845  ;;  %v4310_v31 = vld [vmem:[#allocation19_spill] sm:$0xff] }
 0x1b2   : > { %v3816_v38 = vpop.f32.mrf.mxu1 }
 0x1b4   : > { %v1005_v27 = vpop.f32.mrf.mxu3 }
 0x1b5   : > { %v1006_v45 = vadd.f32 %v1005_v27, %v917_v61  ;;  %v529_v61 = vld [vmem:[%s3101_s27 + $0x2f8] sm:$0xff]  ;;  %v4307_v27 = vld [vmem:[#allocation30_spill] sm:$0xff]  ;;  %2057 = vperm.xlu2 %2749, %v4311_v35   ;;  %v4314_v35 = vld [vmem:[#allocation21_spill] sm:$0xff] }
 0x1b6   : > { %v609_v48 = vpack.c.bf16 %v529_v61, %v525_v26  ;;  %v3855_v61 = vpop.f32.mrf.mxu0 }
 0x1b7   : > { %v1178_v43 = vpack.c.bf16 %v1006_v45, %v1004_v50  ;;  %v920_v50 = vadd.f32 %v4307_v27, %v831_v55  ;;  %v4308_v45 = vld [vmem:[#allocation36_spill] sm:$0xff]  ;;  %v3848_v27 = vpop.f32.mrf.mxu2 }
 0x1b8   : > { %2085 = vperm.xlu0 %2750, %v3445_v60   ;;  %v3844_v59 = vpop.permute.xlu0 %1804 }
 0x1b9   : > { %1047 = vmatmul.bf16.gmra.mxu3 %v605_v46  ;;  %1366 = vmatmul.bf16.gmra.mxu0 %v1178_v43  ;;  %v922_v46 = vadd.f32 %v4308_v45, %v833_v58  ;;  %4313 = vst [vmem:[#allocation16_spill] sm:$0xff] %v3844_v59  ;;  %v3846_v58 = vpop.permute.xlu2 %1857  ;;  %v836_v45 = vadd.f32 %v3674_v54, %v3669_v29 }
 0x1ba   : > { %1455 = vmatmul.bf16.gmra.mxu1 %v1178_v43  ;;  %1544 = vmatmul.bf16.gmra.mxu2 %v1178_v43  ;;  %v3835_v43 = vpop.permute.xlu1 %1809  ;;  %v3842_v51 = vpop.f32.mrf.mxu1 }
 0x1bb   : > { %4309 = vst [vmem:[#allocation17_spill] sm:$0xff] %v3835_v43  ;;  %2077 = vperm.xlu1 %2751, %v4310_v31  }
 0x1bc   : > { %v1008_v49 = vpop.f32.mrf.mxu3 }
 0x1bd   : > { %v1009_v57 = vadd.f32 %v1008_v49, %v920_v50  ;;  %v4315_v50 = vld [vmem:[#allocation20_spill] sm:$0xff] }
 0x1be   : > { %2069 = vperm.xlu2 %2749, %v4315_v50   ;;  %v3878_v43 = vpop.f32.mrf.mxu0 }
 0x1c0   : > { %2097 = vperm.xlu0 %2750, %v4312_v47  }
 0x1c1   : > { %v3865_v47 = vpop.permute.xlu2 %1865 }
 0x1c2   : > { %v3853_v26 = vpop.permute.xlu1 %1853  ;;  %v3861_v31 = vpop.f32.mrf.mxu1 }
 0x1c3   : > { %2089 = vperm.xlu1 %2751, %v4314_v35  }
 0x1c4   : > { %v1010_v60 = vpop.f32.mrf.mxu3 }
 0x1c5   : > { %v1011_v17 = vadd.f32 %v1010_v60, %v922_v46  ;;  %v838_v46 = vadd.f32 %v3692_v62, %v3690_v44  ;;  %v3863_v60 = vpop.permute.xlu0 %1849  ;;  %v3874_v62 = vpop.f32.mrf.mxu2 }
 0x1c6   : > { %2081 = vperm.xlu2 %2749, %v3452_v63  }
 0x1c7   : > { %v1179_v55 = vpack.c.bf16 %v1011_v17, %v1009_v57  ;;  %v533_v57 = vld [vmem:[%s3101_s27 + $0x318] sm:$0xff] }
 0x1c8   : > { %2109 = vperm.xlu0 %2750, %v3481_v22   ;;  %v537_v17 = vld [vmem:[%s3101_s27 + $0x338] sm:$0xff]  ;;  %v925_v22 = vadd.f32 %v3685_v33, %v836_v45 }
 0x1c9   : > { %1052 = vmatmul.bf16.gmra.mxu3 %v609_v48  ;;  %1371 = vmatmul.bf16.gmra.mxu0 %v1179_v55  ;;  %v927_v48 = vadd.f32 %v3708_v32, %v838_v46  ;;  %v613_v44 = vpack.c.bf16 %v537_v17, %v533_v57  ;;  %v3884_v63 = vpop.permute.xlu2 %1877  ;;  %v841_v32 = vadd.f32 %v3713_v7, %v3710_v30  ;;  %v541_v57 = vld [vmem:[%s3101_s27 + $0x358] sm:$0xff] }
 0x1ca   : > { %1460 = vmatmul.bf16.gmra.mxu1 %v1179_v55  ;;  %1549 = vmatmul.bf16.gmra.mxu2 %v1179_v55  ;;  %v3876_v50 = vpop.permute.xlu1 %1861  ;;  %v545_v17 = vld [vmem:[%s3101_s27 + $0x378] sm:$0xff] }
 0x1cb   : > { %2101 = vperm.xlu1 %2751, %v3455_v0   ;;  %v3880_v0 = vpop.f32.mrf.mxu1  ;;  %v617_v7 = vpack.c.bf16 %v545_v17, %v541_v57 }
 0x1cc   : > { %v1013_v49 = vpop.f32.mrf.mxu3 }
 0x1cd   : > { %v1014_v29 = vadd.f32 %v1013_v49, %v925_v22  ;;  %v3882_v33 = vpop.permute.xlu0 %1869  ;;  %v843_v49 = vadd.f32 %v3735_v39, %v3731_v28  ;;  %v3893_v45 = vpop.f32.mrf.mxu2 }
 0x1ce   : > { %2093 = vperm.xlu2 %2749, %v3475_v19   ;;  %v3899_v22 = vpop.f32.mrf.mxu0 }
 0x1cf   : > { %v932_v19 = vadd.f32 %v3747_v37, %v843_v49 }
 0x1d0   : > { %2121 = vperm.xlu0 %2750, %v3498_v42  }
 0x1d2   : > { %v3895_v46 = vpop.permute.xlu1 %1873 }
 0x1d3   : > { %2113 = vperm.xlu1 %2751, %v3478_v20   ;;  %v930_v20 = vadd.f32 %v3726_v53, %v841_v32  ;;  %v553_v32 = vld [vmem:[%s3101_s27 + $0x3b8] sm:$0xff] }
 0x1d4   : > { %v1015_v55 = vpop.f32.mrf.mxu3 }
 0x1d5   : > { %v1016_v54 = vadd.f32 %v1015_v55, %v927_v48  ;;  %v3903_v48 = vpop.f32.mrf.mxu1  ;;  %v3910_v55 = vpop.permute.xlu2 %1889 }
 0x1d6   : > { %2105 = vperm.xlu2 %2749, %v3490_v40   ;;  %v3912_v37 = vpop.f32.mrf.mxu2 }
 0x1d7   : > { %v1180_v35 = vpack.c.bf16 %v1016_v54, %v1014_v29 }
 0x1d8   : > { %2133 = vperm.xlu0 %2750, %v3519_v9   ;;  %v3905_v9 = vpop.permute.xlu0 %1881 }
 0x1d9   : > { %1057 = vmatmul.bf16.gmra.mxu3 %v613_v44  ;;  %1376 = vmatmul.bf16.gmra.mxu0 %v1180_v35  ;;  %v846_v44 = vadd.f32 %v3755_v56, %v3753_v52 }
 0x1da   : > { %1465 = vmatmul.bf16.gmra.mxu1 %v1180_v35  ;;  %1554 = vmatmul.bf16.gmra.mxu2 %v1180_v35  ;;  %v848_v35 = vadd.f32 %v3778_v3, %v3776_v5 }
 0x1db   : > { %2125 = vperm.xlu1 %2751, %v3493_v41   ;;  %v3914_v41 = vpop.permute.xlu1 %1885  ;;  %v935_v49 = vadd.f32 %v3771_v4, %v846_v44  ;;  %v851_v44 = vadd.f32 %v3797_v11, %v3795_v1 }
 0x1dc   : > { %v1018_v42 = vpop.f32.mrf.mxu3 }
 0x1dd   : > { %v1019_v28 = vadd.f32 %v1018_v42, %v930_v20  ;;  %v3921_v53 = vpop.f32.mrf.mxu1  ;;  %v3929_v42 = vpop.permute.xlu2 %1901  ;;  %v4317_v20 = vld [vmem:[#allocation23_spill] sm:$0xff] }
 0x1de   : > { %2117 = vperm.xlu2 %2749, %v3513_v13   ;;  %v937_v13 = vadd.f32 %v3787_v16, %v848_v35  ;;  %v3935_v57 = vpop.f32.mrf.mxu2  ;;  %v853_v35 = vadd.f32 %v3816_v38, %v3814_v24 }
 0x1e0   : > { %2145 = vperm.xlu0 %2750, %v3534_v14   ;;  %v3917_v14 = vpop.f32.mrf.mxu0  ;;  %v3923_v54 = vpop.permute.xlu0 %1893 }
 0x1e3   : > { %2137 = vperm.xlu1 %2751, %v3516_v6   ;;  %v549_v6 = vld [vmem:[%s3101_s27 + $0x398] sm:$0xff] }
 0x1e4   : > { %v1020_v30 = vpop.f32.mrf.mxu3  ;;  %v621_v56 = vpack.c.bf16 %v553_v32, %v549_v6 }
 0x1e5   : > { %v1021_v39 = vadd.f32 %v1020_v30, %v932_v19  ;;  %v3939_v30 = vpop.permute.xlu1 %1897  ;;  %v3947_v16 = vpop.permute.xlu2 %1913 }
 0x1e6   : > { %2129 = vperm.xlu2 %2749, %v4317_v20   ;;  %v940_v20 = vadd.f32 %v3810_v15, %v851_v44 }
 0x1e7   : > { %v1181_v29 = vpack.c.bf16 %v1021_v39, %v1019_v28  ;;  %v3943_v28 = vpop.f32.mrf.mxu1  ;;  %v4318_v39 = vld [vmem:[#allocation26_spill] sm:$0xff] }
 0x1e8   : > { %2157 = vperm.xlu0 %2750, %v3565_v21   ;;  %v4316_v21 = vld [vmem:[#allocation24_spill] sm:$0xff]  ;;  %v3941_v3 = vpop.f32.mrf.mxu0  ;;  %v3945_v4 = vpop.permute.xlu0 %1905 }
 0x1e9   : > { %1062 = vmatmul.bf16.gmra.mxu3 %v617_v7  ;;  %1381 = vmatmul.bf16.gmra.mxu0 %v1181_v29 }
 0x1ea   : > { %1470 = vmatmul.bf16.gmra.mxu1 %v1181_v29  ;;  %1559 = vmatmul.bf16.gmra.mxu2 %v1181_v29  ;;  %v4319_v29 = vld [vmem:[#allocation25_spill] sm:$0xff] }
 0x1eb   : > { %2149 = vperm.xlu1 %2751, %v4316_v21   ;;  %v557_v21 = vld [vmem:[%s3101_s27 + $0x3d8] sm:$0xff] }
 0x1ec   : > { %v1023_v40 = vpop.f32.mrf.mxu3 }
 0x1ed   : > { %v1024_v19 = vadd.f32 %v1023_v40, %v935_v49  ;;  %v3951_v40 = vpop.f32.mrf.mxu2  ;;  %v3957_v6 = vpop.permute.xlu1 %1909 }
 0x1ee   : > { %2141 = vperm.xlu2 %2749, %v4319_v29  }
 0x1ef   : > { %v3961_v49 = vpop.f32.mrf.mxu1 }
 0x1f0   : > { %v3959_v32 = vpop.f32.mrf.mxu0 }
 0x1f3   : > { %2161 = vperm.xlu1 %2751, %v4318_v39  }
 0x1f4   : > { %v1025_v17 = vpop.f32.mrf.mxu3 }
 0x1f5   : > { %v1026_v52 = vadd.f32 %v1025_v17, %v937_v13  ;;  %v3963_v13 = vpop.permute.xlu0 %1917  ;;  %v561_v17 = vld [vmem:[%s3101_s27 + $0x3f8] sm:$0xff]  ;;  %v3974_v39 = vpop.permute.xlu1 %1921  ;;  %s4041_s27 = scalar_lea.vmem [#allocation9], %s2497_s0  ;;  %s2629_s0 = sshll.u32 %s2924_s21, 8 }
 0x1f6   : > { %2153 = vperm.xlu2 %2749, %v3578_v23   ;;  %v625_v38 = vpack.c.bf16 %v561_v17, %v557_v21  ;;  %s2336_s24 = scalar_lea.hbm %s4230_s5, %s2629_s0  ;;  %s2337_s14 = sshll.u32 %s4041_s27, 4  ;;  %s2338_s14 = int_to_ptr.vmem [resolvable:$true] %s2337_s14 }
 0x1f7   : > { %v1182_v5 = vpack.c.bf16 %v1026_v52, %v1024_v19  ;;  %v942_v19 = vadd.f32 %v3829_v34, %v853_v35  ;;  %v3969_v52 = vpop.permute.xlu2 %1925  ;;  %v3978_v34 = vpop.f32.mrf.mxu1  ;;  %v858_v35 = vadd.f32 %v3861_v31, %v3855_v61  ;;  %s2339_s16 = sshll.u32 %s2336_s24, 4  ;;  %s2325_s21 = scalar_lea.sflag [#allocation5], %s3098_s22  ;;  %s2340_s16 = int_to_ptr.hbm [resolvable:$true] %s2339_s16 }
 0x1f8   : > { %v3976_v15 = vpop.f32.mrf.mxu0  ;;  %s2856_s26 = sshra.s32 %s2340_s16, 4  ;;  %s2857_s26 = int_to_ptr.hbm [resolvable:$true] %s2856_s26 }
 0x1f9   : > { %1067 = vmatmul.bf16.gmra.mxu3 %v621_v56  ;;  %1386 = vmatmul.bf16.gmra.mxu0 %v1182_v5  ;;  %v3972_v56 = vpop.f32.mrf.mxu2  ;;  %s2858_s30 = scalar_lea.hbm %s2857_s26, 256  ;;  %p2863_p11 = scmp.lt.s32.totalorder %s2857_s26, %s4230_s5 }
 0x1fa   : > { %1475 = vmatmul.bf16.gmra.mxu1 %v1182_v5  ;;  %1564 = vmatmul.bf16.gmra.mxu2 %v1182_v5  ;;  %p2859_p8 = scmp.ne.s32.totalorder %s2857_s26, %s2858_s30  ;;  %p2864_p12 = scmp.lt.s32.totalorder %s2862_s15, %s2858_s30 }
 0x1fc   : > { %v1028_v7 = vpop.f32.mrf.mxu3  ;;  %p2860_p9 = pnand %p2859_p8, %p3066_p0  ;;  %p2865_p13 = por %p2864_p12, %p2863_p11 }
 0x1fd   : > { %v1029_v11 = vadd.f32 %v1028_v7, %v940_v20  ;;  %v3980_v29 = vpop.permute.xlu0 %1929  ;;  %v856_v7 = vadd.f32 %v3842_v51, %v3838_v18  ;;  %v947_v20 = vadd.f32 %v3874_v62, %v858_v35 }
 0x1fe   : > { %p2861_p10 = pneg %p2860_p9 }
 0x1ff   : > { %v3982_v23 = vpop.permute.xlu2 %1937  ;;  %v945_v17 = vadd.f32 %v3848_v27, %v856_v7  ;;  %v863_v7 = vadd.f32 %v3903_v48, %v3899_v22 }
 0x200   : > { %p2866_p4 = pnand %p2865_p13, %p2861_p10 }
 0x201   : > { %v3988_v21 = vpop.f32.mrf.mxu2 }
 0x204   : > { %v1030_v1 = vpop.f32.mrf.mxu3 }
 0x205   : > { %v1031_v24 = vadd.f32 %v1030_v1, %v942_v19  ;;  %v3992_v19 = vpop.permute.xlu1 %1933  ;;  %v3994_v1 = vpop.f32.mrf.mxu0 }
 0x206   : > { %v3998_v59 = vpop.permute.xlu0 %1941 }
 0x207   : > { %v1183_v5 = vpack.c.bf16 %v1031_v24, %v1029_v11  ;;  %v4000_v18 = vpop.permute.xlu2 %1949 }
 0x208   : > { %4320 = vst [vmem:[#allocation34_spill] sm:$0xff] %v4000_v18 }
 0x209   : > { %1072 = vmatmul.bf16.gmra.mxu3 %v625_v38  ;;  %1391 = vmatmul.bf16.gmra.mxu0 %v1183_v5  ;;  %v3996_v38 = vpop.f32.mrf.mxu1  ;;  %v4002_v27 = vpop.f32.mrf.mxu2 }
 0x20a   : > { %1480 = vmatmul.bf16.gmra.mxu1 %v1183_v5  ;;  %1569 = vmatmul.bf16.gmra.mxu2 %v1183_v5 }
 0x20c   : > { %v1033_v44 = vpop.f32.mrf.mxu3 }
 0x20d   : > { %v1034_v24 = vadd.f32 %v1033_v44, %v945_v17  ;;  %v4004_v31 = vpop.permute.xlu1 %1945  ;;  %v4006_v62 = vpop.f32.mrf.mxu0  ;;  %v861_v44 = vadd.f32 %v3880_v0, %v3878_v43 }
 0x20e   : > { %4321 = vst [vmem:[#allocation30_spill] sm:$0xff] %v4004_v31  ;;  %v4014_v17 = vpop.permute.xlu0 %1953 }
 0x20f   : > { %4322 = vst [vmem:[#allocation36_spill] sm:$0xff] %v4014_v17  ;;  %v4326_v17 = vld [vmem:[#allocation33_spill] sm:$0xff] }
 0x211   : > { %v4012_v35 = vpop.f32.mrf.mxu1 }
 0x214   : > { %v1035_v11 = vpop.f32.mrf.mxu3 }
 0x215   : > { %v1036_v5 = vadd.f32 %v1035_v11, %v947_v20  ;;  %v4016_v20 = vpop.permute.xlu2 %1961  ;;  %v950_v11 = vadd.f32 %v3893_v45, %v861_v44  ;;  %v4022_v22 = vpop.permute.xlu1 %1957 }
 0x216   : > { %4323 = vst [vmem:[#allocation19_spill] sm:$0xff] %v4016_v20  ;;  %v4024_v48 = vpop.permute.xlu0 %1965 }
 0x217   : > { %v1184_v51 = vpack.c.bf16 %v1036_v5, %v1034_v24  ;;  %v952_v24 = vadd.f32 %v3912_v37, %v863_v7  ;;  %4324 = vst [vmem:[#allocation18_spill] sm:$0xff] %v4022_v22 }
 0x218   : > { %4325 = vst [vmem:[#allocation22_spill] sm:$0xff] %v4024_v48 }
 0x219   : > { %1396 = vmatmul.bf16.gmra.mxu0 %v1184_v51 }
 0x21a   : > { %1485 = vmatmul.bf16.gmra.mxu1 %v1184_v51  ;;  %1574 = vmatmul.bf16.gmra.mxu2 %v1184_v51  ;;  %v4020_v51 = vpop.f32.mrf.mxu2 }
 0x21c   : > { %v1038_v61 = vpop.f32.mrf.mxu3 }
 0x21d   : > { %v1039_v18 = vadd.f32 %v1038_v61, %v950_v11  ;;  %v2038_v37 = vpop.permute.xlu2 %2037 }
 0x224   : > { %v1040_v5 = vpop.f32.mrf.mxu3 }
 0x225   : > { %v1041_v36 = vadd.f32 %v1040_v5, %v952_v24  ;;  %v868_v24 = vadd.f32 %v3943_v28, %v3941_v3  ;;  %v2228_v5 = vld [vmem:[%s3114_s3] sm:$0xff] }
 0x226   : > { %v1362_v31 = vpop.f32.mrf.mxu0 }
 0x227   : > { %v1185_v43 = vpack.c.bf16 %v1041_v36, %v1039_v18  ;;  %v1451_v0 = vpop.f32.mrf.mxu1  ;;  %v1812_v20 = vmul.f32 %v4326_v17, %v1362_v31  ;;  %v866_v18 = vadd.f32 %v3921_v53, %v3917_v14  ;;  %v4033_v17 = vpop.permute.xlu1 %1969 }
 0x228   : > { %v1972_v45 = vmul.f32 %v3823_v8, %v1451_v0 }
 0x229   : > { %1401 = vmatmul.bf16.gmra.mxu0 %v1185_v43 }
 0x22a   : > { %1490 = vmatmul.bf16.gmra.mxu1 %v1185_v43  ;;  %1579 = vmatmul.bf16.gmra.mxu2 %v1185_v43  ;;  %v2004_v61 = vadd.f32 %v1972_v45, %v1812_v20  ;;  %v4327_v43 = vld [vmem:[#allocation39_spill] sm:$0xff]  ;;  %v955_v20 = vadd.f32 %v3935_v57, %v866_v18  ;;  %v957_v45 = vadd.f32 %v3951_v40, %v868_v24  ;;  %v4328_v18 = vld [vmem:[#allocation32_spill] sm:$0xff] }
 0x22c   : > { %v1043_v44 = vpop.f32.mrf.mxu3 }
 0x22d   : > { %v1540_v7 = vpop.f32.mrf.mxu2  ;;  %v1044_v53 = vadd.f32 %v1043_v44, %v955_v20  ;;  %v871_v20 = vadd.f32 %v3961_v49, %v3959_v32 }
 0x22e   : > { %v2164_v11 = vmul.f32 %v2038_v37, %v1540_v7  ;;  %v1364_v36 = vpop.f32.mrf.mxu0  ;;  %v2042_v37 = vpop.permute.xlu0 %2041 }
 0x22f   : > { %v1453_v48 = vpop.f32.mrf.mxu1  ;;  %v1813_v0 = vmul.f32 %v4327_v43, %v1364_v36  ;;  %v2046_v44 = vpop.permute.xlu1 %2045 }
 0x230   : > { %v2196_v31 = vadd.f32 %v2164_v11, %v2004_v61  ;;  %v1973_v22 = vmul.f32 %v3863_v60, %v1453_v48  ;;  %v2229_v60 = vld [vmem:[%s3114_s3 + $0x8] sm:$0xff] }
 0x232   : > { %v2260_v8 = vadd.f32 %v2228_v5, %v2196_v31  ;;  %v2005_v7 = vadd.f32 %v1973_v22, %v1813_v0 }
 0x234   : > { %2292 = vst [vmem:[%s4041_s27] sm:$0xff] %v2260_v8  ;;  %v1045_v14 = vpop.f32.mrf.mxu3 }
 0x235   : > { %v1046_v3 = vadd.f32 %v1045_v14, %v957_v45  ;;  %v1542_v28 = vpop.f32.mrf.mxu2  ;;  %v873_v45 = vadd.f32 %v3978_v34, %v3976_v15 }
 0x236   : > { %v2165_v61 = vmul.f32 %v2042_v37, %v1542_v28  ;;  %v1367_v11 = vpop.f32.mrf.mxu0  ;;  %v2230_v37 = vld [vmem:[%s3114_s3 + $0x10] sm:$0xff] }
 0x237   : > { %v1186_v36 = vpack.c.bf16 %v1046_v3, %v1044_v53  ;;  %v1456_v48 = vpop.f32.mrf.mxu1  ;;  %v1814_v24 = vmul.f32 %v4328_v18, %v1367_v11  ;;  %v4329_v3 = vld [vmem:[#allocation38_spill] sm:$0xff]  ;;  %v962_v11 = vadd.f32 %v3988_v21, %v873_v45  ;;  %v2231_v18 = vld [vmem:[%s3114_s3 + $0x18] sm:$0xff]  ;;  %v876_v45 = vadd.f32 %v3996_v38, %v3994_v1 }
 0x238   : > { %v2197_v57 = vadd.f32 %v2165_v61, %v2005_v7  ;;  %v1974_v5 = vmul.f32 %v3853_v26, %v1456_v48  ;;  %v960_v61 = vadd.f32 %v3972_v56, %v871_v20  ;;  %v4330_v56 = vld [vmem:[#allocation28_spill] sm:$0xff] }
 0x239   : > { %1406 = vmatmul.bf16.gmra.mxu0 %v1186_v36 }
 0x23a   : > { %v2261_v40 = vadd.f32 %v2229_v60, %v2197_v57  ;;  %1495 = vmatmul.bf16.gmra.mxu1 %v1186_v36  ;;  %1584 = vmatmul.bf16.gmra.mxu2 %v1186_v36  ;;  %v2006_v8 = vadd.f32 %v1974_v5, %v1814_v24  ;;  %v2050_v36 = vpop.permute.xlu2 %2049 }
 0x23c   : > { %2293 = vst [vmem:[%s4041_s27 + $0x8] sm:$0xff] %v2261_v40  ;;  %v1048_v31 = vpop.f32.mrf.mxu3 }
 0x23d   : > { %v1545_v22 = vpop.f32.mrf.mxu2  ;;  %v1049_v32 = vadd.f32 %v1048_v31, %v960_v61  ;;  %v2054_v31 = vpop.permute.xlu1 %2053  ;;  %v965_v61 = vadd.f32 %v4002_v27, %v876_v45  ;;  %v4332_v27 = vld [vmem:[#allocation43_spill] sm:$0xff] }
 0x23e   : > { %v2166_v43 = vmul.f32 %v2046_v44, %v1545_v22  ;;  %v1369_v0 = vpop.f32.mrf.mxu0 }
 0x23f   : > { %v1458_v14 = vpop.f32.mrf.mxu1  ;;  %v1815_v28 = vmul.f32 %v4329_v3, %v1369_v0  ;;  %v4331_v3 = vld [vmem:[#allocation31_spill] sm:$0xff] }
 0x240   : > { %v2198_v53 = vadd.f32 %v2166_v43, %v2006_v8  ;;  %v1975_v7 = vmul.f32 %v3846_v58, %v1458_v14  ;;  %v2232_v14 = vld [vmem:[%s3114_s3 + $0x20] sm:$0xff] }
 0x242   : > { %v2262_v26 = vadd.f32 %v2230_v37, %v2198_v53  ;;  %v2007_v34 = vadd.f32 %v1975_v7, %v1815_v28  ;;  %v878_v37 = vadd.f32 %v4012_v35, %v4006_v62 }
 0x244   : > { %2294 = vst [vmem:[%s4041_s27 + $0x10] sm:$0xff] %v2262_v26  ;;  %v1050_v60 = vpop.f32.mrf.mxu3 }
 0x245   : > { %v1051_v49 = vadd.f32 %v1050_v60, %v962_v11  ;;  %v1547_v15 = vpop.f32.mrf.mxu2  ;;  %v967_v11 = vadd.f32 %v4020_v51, %v878_v37  ;;  %v4334_v37 = vld [vmem:[#allocation27_spill] sm:$0xff] }
 0x246   : > { %v2167_v48 = vmul.f32 %v2050_v36, %v1547_v15  ;;  %v1372_v57 = vpop.f32.mrf.mxu0  ;;  %v2058_v36 = vpop.permute.xlu2 %2057 }
 0x247   : > { %v1187_v40 = vpack.c.bf16 %v1051_v49, %v1049_v32  ;;  %v1461_v24 = vpop.f32.mrf.mxu1  ;;  %v1816_v44 = vmul.f32 %v4330_v56, %v1372_v57 }
 0x248   : > { %v2199_v5 = vadd.f32 %v2167_v48, %v2007_v34  ;;  %v1976_v21 = vmul.f32 %v3876_v50, %v1461_v24  ;;  %v2233_v34 = vld [vmem:[%s3114_s3 + $0x28] sm:$0xff] }
 0x249   : > { %1411 = vmatmul.bf16.gmra.mxu0 %v1187_v40 }
 0x24a   : > { %v2263_v58 = vadd.f32 %v2231_v18, %v2199_v5  ;;  %1500 = vmatmul.bf16.gmra.mxu1 %v1187_v40  ;;  %1589 = vmatmul.bf16.gmra.mxu2 %v1187_v40  ;;  %v2008_v43 = vadd.f32 %v1976_v21, %v1816_v44  ;;  %v2062_v18 = vpop.permute.xlu0 %2061  ;;  %v2234_v21 = vld [vmem:[%s3114_s3 + $0x30] sm:$0xff] }
 0x24c   : > { %2295 = vst [vmem:[%s4041_s27 + $0x18] sm:$0xff] %v2263_v58  ;;  %v1053_v22 = vpop.f32.mrf.mxu3 }
 0x24d   : > { %v1550_v8 = vpop.f32.mrf.mxu2  ;;  %v1054_v1 = vadd.f32 %v1053_v22, %v965_v61 }
 0x24e   : > { %v2168_v0 = vmul.f32 %v2054_v31, %v1550_v8  ;;  %v1374_v20 = vpop.f32.mrf.mxu0 }
 0x24f   : > { %v1463_v53 = vpop.f32.mrf.mxu1  ;;  %v1817_v28 = vmul.f32 %v4331_v3, %v1374_v20 }
 0x250   : > { %v2200_v26 = vadd.f32 %v2168_v0, %v2008_v43  ;;  %v1977_v7 = vmul.f32 %v3865_v47, %v1463_v53  ;;  %v4333_v43 = vld [vmem:[#allocation42_spill] sm:$0xff]  ;;  %v4335_v53 = vld [vmem:[#allocation29_spill] sm:$0xff] }
 0x252   : > { %v2264_v50 = vadd.f32 %v2232_v14, %v2200_v26  ;;  %v2009_v35 = vadd.f32 %v1977_v7, %v1817_v28 }
 0x254   : > { %2296 = vst [vmem:[%s4041_s27 + $0x20] sm:$0xff] %v2264_v50  ;;  %v1055_v60 = vpop.f32.mrf.mxu3 }
 0x255   : > { %v1056_v38 = vadd.f32 %v1055_v60, %v967_v11  ;;  %v1552_v62 = vpop.f32.mrf.mxu2  ;;  %v2235_v11 = vld [vmem:[%s3114_s3 + $0x38] sm:$0xff] }
 0x256   : > { %v2169_v32 = vmul.f32 %v2058_v36, %v1552_v62  ;;  %v1377_v49 = vpop.f32.mrf.mxu0 }
 0x257   : > { %v1188_v15 = vpack.c.bf16 %v1056_v38, %v1054_v1  ;;  %v1466_v48 = vpop.f32.mrf.mxu1  ;;  %v1818_v40 = vmul.f32 %v4332_v27, %v1377_v49 }
 0x258   : > { %v2201_v57 = vadd.f32 %v2169_v32, %v2009_v35  ;;  %v1978_v51 = vmul.f32 %v3882_v33, %v1466_v48  ;;  %v2066_v33 = vpop.permute.xlu1 %2065  ;;  %v2070_v35 = vpop.permute.xlu2 %2069 }
 0x259   : > { %1416 = vmatmul.bf16.gmra.mxu0 %v1188_v15 }
 0x25a   : > { %v2265_v47 = vadd.f32 %v2233_v34, %v2201_v57  ;;  %1505 = vmatmul.bf16.gmra.mxu1 %v1188_v15  ;;  %1594 = vmatmul.bf16.gmra.mxu2 %v1188_v15  ;;  %v2010_v58 = vadd.f32 %v1978_v51, %v1818_v40  ;;  %v2236_v57 = vld [vmem:[%s3114_s3 + $0x40] sm:$0xff]  ;;  %v4337_v51 = vld [vmem:[#allocation47_spill] sm:$0xff] }
 0x25c   : > { %2297 = vst [vmem:[%s4041_s27 + $0x28] sm:$0xff] %v2265_v47  ;;  %v1058_v24 = vpop.f32.mrf.mxu3 }
 0x25d   : > { %v1555_v5 = vpop.f32.mrf.mxu2  ;;  %v1059_v14 = vadd.f32 %v1058_v24, %v4334_v37 }
 0x25e   : > { %v2170_v56 = vmul.f32 %v2062_v18, %v1555_v5  ;;  %v1379_v44 = vpop.f32.mrf.mxu0 }
 0x25f   : > { %v1468_v31 = vpop.f32.mrf.mxu1  ;;  %v1819_v0 = vmul.f32 %v4333_v43, %v1379_v44  ;;  %v4339_v44 = vld [vmem:[#allocation40_spill] sm:$0xff] }
 0x260   : > { %v2202_v22 = vadd.f32 %v2170_v56, %v2010_v58  ;;  %v1979_v20 = vmul.f32 %v3895_v46, %v1468_v31  ;;  %v4336_v46 = vld [vmem:[#allocation37_spill] sm:$0xff]  ;;  %v4338_v58 = vld [vmem:[#allocation35_spill] sm:$0xff] }
 0x262   : > { %v2266_v8 = vadd.f32 %v2234_v21, %v2202_v22  ;;  %v2011_v3 = vadd.f32 %v1979_v20, %v1819_v0  ;;  %v2237_v20 = vld [vmem:[%s3114_s3 + $0x48] sm:$0xff] }
 0x264   : > { %2298 = vst [vmem:[%s4041_s27 + $0x30] sm:$0xff] %v2266_v8  ;;  %v1060_v45 = vpop.f32.mrf.mxu3 }
 0x265   : > { %v1061_v26 = vadd.f32 %v1060_v45, %v4335_v53  ;;  %v1557_v50 = vpop.f32.mrf.mxu2 }
 0x266   : > { %v2171_v28 = vmul.f32 %v2066_v33, %v1557_v50  ;;  %v1382_v7 = vpop.f32.mrf.mxu0 }
 0x267   : > { %v1189_v61 = vpack.c.bf16 %v1061_v26, %v1059_v14  ;;  %v1471_v36 = vpop.f32.mrf.mxu1  ;;  %v1820_v38 = vmul.f32 %v4336_v46, %v1382_v7  ;;  %v2078_v26 = vpop.permute.xlu1 %2077  ;;  %v4341_v46 = vld [vmem:[#allocation41_spill] sm:$0xff] }
 0x268   : > { %v2203_v60 = vadd.f32 %v2171_v28, %v2011_v3  ;;  %v1980_v62 = vmul.f32 %v3884_v63, %v1471_v36  ;;  %v2074_v63 = vpop.permute.xlu0 %2073 }
 0x269   : > { %1421 = vmatmul.bf16.gmra.mxu0 %v1189_v61 }
 0x26a   : > { %v2267_v1 = vadd.f32 %v2235_v11, %v2203_v60  ;;  %1510 = vmatmul.bf16.gmra.mxu1 %v1189_v61  ;;  %1599 = vmatmul.bf16.gmra.mxu2 %v1189_v61  ;;  %v2012_v15 = vadd.f32 %v1980_v62, %v1820_v38  ;;  %v2238_v11 = vld [vmem:[%s3114_s3 + $0x50] sm:$0xff] }
 0x26c   : > { %2299 = vst [vmem:[%s4041_s27 + $0x38] sm:$0xff] %v2267_v1  ;;  %v1063_v32 = vpop.f32.mrf.mxu3 }
 0x26d   : > { %v1560_v49 = vpop.f32.mrf.mxu2  ;;  %v1064_v56 = vadd.f32 %v1063_v32, %v4338_v58  ;;  %v4342_v32 = vld [vmem:[#allocation44_spill] sm:$0xff] }
 0x26e   : > { %v2172_v34 = vmul.f32 %v2070_v35, %v1560_v49  ;;  %v1384_v48 = vpop.f32.mrf.mxu0 }
 0x26f   : > { %v1473_v47 = vpop.f32.mrf.mxu1  ;;  %v1821_v18 = vmul.f32 %v4337_v51, %v1384_v48  ;;  %v2239_v51 = vld [vmem:[%s3114_s3 + $0x58] sm:$0xff] }
 0x270   : > { %v2204_v27 = vadd.f32 %v2172_v34, %v2012_v15  ;;  %v1981_v24 = vmul.f32 %v3905_v9, %v1473_v47  ;;  %v4340_v9 = vld [vmem:[#allocation46_spill] sm:$0xff]  ;;  %v4343_v15 = vld [vmem:[#allocation48_spill] sm:$0xff] }
 0x272   : > { %v2268_v40 = vadd.f32 %v2236_v57, %v2204_v27  ;;  %v2013_v22 = vadd.f32 %v1981_v24, %v1821_v18 }
 0x274   : > { %2300 = vst [vmem:[%s4041_s27 + $0x40] sm:$0xff] %v2268_v40  ;;  %v1065_v5 = vpop.f32.mrf.mxu3 }
 0x275   : > { %v1066_v21 = vadd.f32 %v1065_v5, %v4339_v44  ;;  %v1562_v31 = vpop.f32.mrf.mxu2 }
 0x276   : > { %v2173_v8 = vmul.f32 %v2074_v63, %v1562_v31  ;;  %v1387_v43 = vpop.f32.mrf.mxu0 }
 0x277   : > { %v1190_v0 = vpack.c.bf16 %v1066_v21, %v1064_v56  ;;  %v1476_v33 = vpop.f32.mrf.mxu1  ;;  %v1822_v14 = vmul.f32 %v4340_v9, %v1387_v43  ;;  %v2086_v56 = vpop.permute.xlu0 %2085  ;;  %v2240_v43 = vld [vmem:[%s3114_s3 + $0x60] sm:$0xff] }
 0x278   : > { %v2205_v45 = vadd.f32 %v2173_v8, %v2013_v22  ;;  %v1982_v53 = vmul.f32 %v3914_v41, %v1476_v33  ;;  %v2082_v41 = vpop.permute.xlu2 %2081 }
 0x279   : > { %1426 = vmatmul.bf16.gmra.mxu0 %v1190_v0 }
 0x27a   : > { %v2269_v37 = vadd.f32 %v2237_v20, %v2205_v45  ;;  %1515 = vmatmul.bf16.gmra.mxu1 %v1190_v0  ;;  %1604 = vmatmul.bf16.gmra.mxu2 %v1190_v0  ;;  %v2014_v28 = vadd.f32 %v1982_v53, %v1822_v14  ;;  %v4345_v45 = vld [vmem:[#allocation50_spill] sm:$0xff]  ;;  %v4346_v53 = vld [vmem:[#allocation52_spill] sm:$0xff] }
 0x27c   : > { %2301 = vst [vmem:[%s4041_s27 + $0x48] sm:$0xff] %v2269_v37  ;;  %v1068_v50 = vpop.f32.mrf.mxu3 }
 0x27d   : > { %v1565_v3 = vpop.f32.mrf.mxu2  ;;  %v1069_v49 = vadd.f32 %v1068_v50, %v4342_v32  ;;  %v4347_v50 = vld [vmem:[#allocation55_spill] sm:$0xff] }
 0x27e   : > { %v2174_v7 = vmul.f32 %v2078_v26, %v1565_v3  ;;  %v1389_v61 = vpop.f32.mrf.mxu0 }
 0x27f   : > { %v1478_v36 = vpop.f32.mrf.mxu1  ;;  %v1823_v38 = vmul.f32 %v4341_v46, %v1389_v61 }
 0x280   : > { %v2206_v60 = vadd.f32 %v2174_v7, %v2014_v28  ;;  %v1983_v62 = vmul.f32 %v3910_v55, %v1478_v36  ;;  %v4344_v55 = vld [vmem:[#allocation51_spill] sm:$0xff] }
 0x282   : > { %v2270_v1 = vadd.f32 %v2238_v11, %v2206_v60  ;;  %v2015_v57 = vadd.f32 %v1983_v62, %v1823_v38  ;;  %v2241_v60 = vld [vmem:[%s3114_s3 + $0x68] sm:$0xff] }
 0x284   : > { %2302 = vst [vmem:[%s4041_s27 + $0x50] sm:$0xff] %v2270_v1  ;;  %v1070_v35 = vpop.f32.mrf.mxu3 }
 0x285   : > { %v1071_v34 = vadd.f32 %v1070_v35, %v4343_v15  ;;  %v1567_v48 = vpop.f32.mrf.mxu2  ;;  %v2094_v35 = vpop.permute.xlu2 %2093 }
 0x286   : > { %v2175_v47 = vmul.f32 %v2082_v41, %v1567_v48  ;;  %v1392_v27 = vpop.f32.mrf.mxu0  ;;  %v2242_v48 = vld [vmem:[%s3114_s3 + $0x70] sm:$0xff] }
 0x287   : > { %v1191_v40 = vpack.c.bf16 %v1071_v34, %v1069_v49  ;;  %v1481_v18 = vpop.f32.mrf.mxu1  ;;  %v1824_v5 = vmul.f32 %v4344_v55, %v1392_v27 }
 0x288   : > { %v2207_v24 = vadd.f32 %v2175_v47, %v2015_v57  ;;  %v1984_v58 = vmul.f32 %v3923_v54, %v1481_v18  ;;  %v2090_v54 = vpop.permute.xlu1 %2089 }
 0x289   : > { %1431 = vmatmul.bf16.gmra.mxu0 %v1191_v40 }
 0x28a   : > { %v2271_v63 = vadd.f32 %v2239_v51, %v2207_v24  ;;  %1520 = vmatmul.bf16.gmra.mxu1 %v1191_v40  ;;  %1609 = vmatmul.bf16.gmra.mxu2 %v1191_v40  ;;  %v2016_v31 = vadd.f32 %v1984_v58, %v1824_v5  ;;  %v4349_v40 = vld [vmem:[#allocation54_spill] sm:$0xff]  ;;  %v2243_v58 = vld [vmem:[%s3114_s3 + $0x78] sm:$0xff] }
 0x28c   : > { %2303 = vst [vmem:[%s4041_s27 + $0x58] sm:$0xff] %v2271_v63  ;;  %v1073_v44 = vpop.f32.mrf.mxu3 }
 0x28d   : > { %v1570_v21 = vpop.f32.mrf.mxu2  ;;  %v1074_v26 = vadd.f32 %v1073_v44, %v4346_v53 }
 0x28e   : > { %v2176_v22 = vmul.f32 %v2086_v56, %v1570_v21  ;;  %v1394_v8 = vpop.f32.mrf.mxu0 }
 0x28f   : > { %v1483_v0 = vpop.f32.mrf.mxu1  ;;  %v1825_v37 = vmul.f32 %v4345_v45, %v1394_v8  ;;  %v2244_v45 = vld [vmem:[%s3114_s3 + $0x80] sm:$0xff] }
 0x290   : > { %v2208_v20 = vadd.f32 %v2176_v22, %v2016_v31  ;;  %v1985_v9 = vmul.f32 %v3939_v30, %v1483_v0  ;;  %v4348_v30 = vld [vmem:[#allocation45_spill] sm:$0xff] }
 0x291   : > { %v4350_v31 = vld [vmem:[#allocation53_spill] sm:$0xff] }
 0x292   : > { %v2272_v33 = vadd.f32 %v2240_v43, %v2208_v20  ;;  %v2017_v7 = vadd.f32 %v1985_v9, %v1825_v37  ;;  %v2102_v43 = vpop.permute.xlu1 %2101 }
 0x294   : > { %2304 = vst [vmem:[%s4041_s27 + $0x60] sm:$0xff] %v2272_v33  ;;  %v1075_v14 = vpop.f32.mrf.mxu3 }
 0x295   : > { %v1076_v3 = vadd.f32 %v1075_v14, %v4347_v50  ;;  %v1572_v28 = vpop.f32.mrf.mxu2  ;;  %v4351_v14 = vld [vmem:[#allocation49_spill] sm:$0xff]  ;;  %v2106_v50 = vpop.permute.xlu2 %2105 }
 0x296   : > { %v2177_v61 = vmul.f32 %v2090_v54, %v1572_v28  ;;  %v1397_v11 = vpop.f32.mrf.mxu0 }
 0x297   : > { %v1192_v36 = vpack.c.bf16 %v1076_v3, %v1074_v26  ;;  %v1486_v1 = vpop.f32.mrf.mxu1  ;;  %v1826_v62 = vmul.f32 %v4348_v30, %v1397_v11 }
 0x298   : > { %v2209_v46 = vadd.f32 %v2177_v61, %v2017_v7  ;;  %v1986_v41 = vmul.f32 %v3929_v42, %v1486_v1  ;;  %v2098_v42 = vpop.permute.xlu0 %2097  ;;  %v2245_v61 = vld [vmem:[%s3114_s3 + $0x88] sm:$0xff]  ;;  %v4352_v1 = vld [vmem:[#allocation58_spill] sm:$0xff] }
 0x299   : > { %1436 = vmatmul.bf16.gmra.mxu0 %v1192_v36 }
 0x29a   : > { %v2273_v38 = vadd.f32 %v2241_v60, %v2209_v46  ;;  %1525 = vmatmul.bf16.gmra.mxu1 %v1192_v36  ;;  %1614 = vmatmul.bf16.gmra.mxu2 %v1192_v36  ;;  %v2018_v49 = vadd.f32 %v1986_v41, %v1826_v62 }
 0x29c   : > { %2305 = vst [vmem:[%s4041_s27 + $0x68] sm:$0xff] %v2273_v38 }
 0x29d   : > { %v1575_v32 = vpop.f32.mrf.mxu2 }
 0x29e   : > { %v2178_v15 = vmul.f32 %v2094_v35, %v1575_v32  ;;  %v1399_v34 = vpop.f32.mrf.mxu0  ;;  %v2246_v32 = vld [vmem:[%s3114_s3 + $0x90] sm:$0xff] }
 0x29f   : > { %v1488_v57 = vpop.f32.mrf.mxu1  ;;  %v1827_v51 = vmul.f32 %v4349_v40, %v1399_v34 }
 0x2a0   : > { %v2210_v47 = vadd.f32 %v2178_v15, %v2018_v49  ;;  %v1987_v18 = vmul.f32 %v3945_v4, %v1488_v57  ;;  %v2110_v30 = vpop.permute.xlu0 %2109 }
 0x2a2   : > { %v2274_v27 = vadd.f32 %v2242_v48, %v2210_v47  ;;  %v2019_v63 = vadd.f32 %v1987_v18, %v1827_v51  ;;  %v4353_v48 = vld [vmem:[#allocation57_spill] sm:$0xff] }
 0x2a4   : > { %2306 = vst [vmem:[%s4041_s27 + $0x70] sm:$0xff] %v2274_v27  ;;  %v2114_v27 = vpop.permute.xlu1 %2113 }
 0x2a5   : > { %v1577_v24 = vpop.f32.mrf.mxu2 }
 0x2a6   : > { %v2179_v55 = vmul.f32 %v2098_v42, %v1577_v24  ;;  %v1402_v5 = vpop.f32.mrf.mxu0  ;;  %v2247_v42 = vld [vmem:[%s3114_s3 + $0x98] sm:$0xff] }
 0x2a7   : > { %v1491_v56 = vpop.f32.mrf.mxu1  ;;  %v1828_v22 = vmul.f32 %v4350_v31, %v1402_v5  ;;  %v4354_v5 = vld [vmem:[#allocation56_spill] sm:$0xff] }
 0x2a8   : > { %v2211_v44 = vadd.f32 %v2179_v55, %v2019_v63  ;;  %v1988_v8 = vmul.f32 %v3957_v6, %v1491_v56 }
 0x2aa   : > { %v2275_v21 = vadd.f32 %v2243_v58, %v2211_v44  ;;  %v2020_v4 = vadd.f32 %v1988_v8, %v1828_v22  ;;  %v2118_v44 = vpop.permute.xlu2 %2117  ;;  %v2248_v8 = vld [vmem:[%s3114_s3 + $0xa0] sm:$0xff] }
 0x2ac   : > { %2307 = vst [vmem:[%s4041_s27 + $0x78] sm:$0xff] %v2275_v21 }
 0x2ad   : > { %v1580_v0 = vpop.f32.mrf.mxu2 }
 0x2ae   : > { %v2180_v20 = vmul.f32 %v2102_v43, %v1580_v0  ;;  %v1404_v33 = vpop.f32.mrf.mxu0 }
 0x2af   : > { %v1493_v37 = vpop.f32.mrf.mxu1  ;;  %v1829_v53 = vmul.f32 %v4351_v14, %v1404_v33  ;;  %v2249_v14 = vld [vmem:[%s3114_s3 + $0xa8] sm:$0xff] }
 0x2b0   : > { %v2212_v9 = vadd.f32 %v2180_v20, %v2020_v4  ;;  %v1989_v26 = vmul.f32 %v3947_v16, %v1493_v37 }
 0x2b2   : > { %v2276_v54 = vadd.f32 %v2244_v45, %v2212_v9  ;;  %v2021_v6 = vadd.f32 %v1989_v26, %v1829_v53  ;;  %v2122_v45 = vpop.permute.xlu0 %2121 }
 0x2b4   : > { %2308 = vst [vmem:[%s4041_s27 + $0x80] sm:$0xff] %v2276_v54 }
 0x2b5   : > { %v1582_v3 = vpop.f32.mrf.mxu2 }
 0x2b6   : > { %v2181_v28 = vmul.f32 %v2106_v50, %v1582_v3  ;;  %v1407_v7 = vpop.f32.mrf.mxu0 }
 0x2b7   : > { %v1496_v11 = vpop.f32.mrf.mxu1  ;;  %v1830_v46 = vmul.f32 %v4352_v1, %v1407_v7 }
 0x2b8   : > { %v2213_v36 = vadd.f32 %v2181_v28, %v2021_v6  ;;  %v1990_v38 = vmul.f32 %v3963_v13, %v1496_v11  ;;  %v2250_v11 = vld [vmem:[%s3114_s3 + $0xb0] sm:$0xff] }
 0x2ba   : > { %v2277_v60 = vadd.f32 %v2245_v61, %v2213_v36  ;;  %v2022_v16 = vadd.f32 %v1990_v38, %v1830_v46  ;;  %v4355_v46 = vld [vmem:[#allocation59_spill] sm:$0xff] }
 0x2bc   : > { %2309 = vst [vmem:[%s4041_s27 + $0x88] sm:$0xff] %v2277_v60 }
 0x2bd   : > { %v1585_v62 = vpop.f32.mrf.mxu2 }
 0x2be   : > { %v2182_v41 = vmul.f32 %v2110_v30, %v1585_v62  ;;  %v1409_v35 = vpop.f32.mrf.mxu0 }
 0x2bf   : > { %v1498_v49 = vpop.f32.mrf.mxu1  ;;  %v1831_v57 = vmul.f32 %v4353_v48, %v1409_v35  ;;  %v2251_v35 = vld [vmem:[%s3114_s3 + $0xb8] sm:$0xff] }
 0x2c0   : > { %v2214_v15 = vadd.f32 %v2182_v41, %v2022_v16  ;;  %v1991_v47 = vmul.f32 %v3974_v39, %v1498_v49 }
 0x2c2   : > { %v2278_v34 = vadd.f32 %v2246_v32, %v2214_v15  ;;  %v2023_v13 = vadd.f32 %v1991_v47, %v1831_v57  ;;  %v2134_v57 = vpop.permute.xlu0 %2133 }
 0x2c4   : > { %2310 = vst [vmem:[%s4041_s27 + $0x90] sm:$0xff] %v2278_v34 }
 0x2c5   : > { %v1587_v40 = vpop.f32.mrf.mxu2 }
 0x2c6   : > { %v2183_v51 = vmul.f32 %v2114_v27, %v1587_v40  ;;  %v1412_v18 = vpop.f32.mrf.mxu0 }
 0x2c7   : > { %v1501_v24 = vpop.f32.mrf.mxu1  ;;  %v1832_v58 = vmul.f32 %v4354_v5, %v1412_v18 }
 0x2c8   : > { %v2215_v63 = vadd.f32 %v2183_v51, %v2023_v13  ;;  %v1992_v56 = vmul.f32 %v3969_v52, %v1501_v24  ;;  %v2252_v13 = vld [vmem:[%s3114_s3 + $0xc0] sm:$0xff] }
 0x2ca   : > { %v2279_v55 = vadd.f32 %v2247_v42, %v2215_v63  ;;  %v2024_v39 = vadd.f32 %v1992_v56, %v1832_v58  ;;  %v4356_v63 = vld [vmem:[#allocation30_spill] sm:$0xff] }
 0x2cc   : > { %2311 = vst [vmem:[%s4041_s27 + $0x98] sm:$0xff] %v2279_v55 }
 0x2cd   : > { %v1590_v21 = vpop.f32.mrf.mxu2 }
 0x2ce   : > { %v2184_v31 = vmul.f32 %v2118_v44, %v1590_v21  ;;  %v1414_v22 = vpop.f32.mrf.mxu0  ;;  %v2253_v44 = vld [vmem:[%s3114_s3 + $0xc8] sm:$0xff] }
 0x2cf   : > { %v1503_v43 = vpop.f32.mrf.mxu1  ;;  %v1833_v20 = vmul.f32 %v3780_v12, %v1414_v22  ;;  %v2126_v12 = vpop.permute.xlu1 %2125  ;;  %v4357_v22 = vld [vmem:[#allocation60_spill] sm:$0xff] }
 0x2d0   : > { %v2216_v0 = vadd.f32 %v2184_v31, %v2024_v39  ;;  %v1993_v33 = vmul.f32 %v3980_v29, %v1503_v43  ;;  %v4358_v43 = vld [vmem:[#allocation34_spill] sm:$0xff] }
 0x2d2   : > { %v2280_v4 = vadd.f32 %v2248_v8, %v2216_v0  ;;  %v2025_v52 = vadd.f32 %v1993_v33, %v1833_v20 }
 0x2d4   : > { %2312 = vst [vmem:[%s4041_s27 + $0xa0] sm:$0xff] %v2280_v4 }
 0x2d5   : > { %v1592_v37 = vpop.f32.mrf.mxu2 }
 0x2d6   : > { %v2185_v9 = vmul.f32 %v2122_v45, %v1592_v37  ;;  %v1417_v54 = vpop.f32.mrf.mxu0  ;;  %v2254_v37 = vld [vmem:[%s3114_s3 + $0xd0] sm:$0xff] }
 0x2d7   : > { %v1506_v53 = vpop.f32.mrf.mxu1  ;;  %v1834_v3 = vmul.f32 %v3774_v10, %v1417_v54  ;;  %v2130_v10 = vpop.permute.xlu2 %2129 }
 0x2d8   : > { %v2217_v26 = vadd.f32 %v2185_v9, %v2025_v52  ;;  %v1994_v6 = vmul.f32 %v3992_v19, %v1506_v53 }
 0x2da   : > { %v2281_v50 = vadd.f32 %v2249_v14, %v2217_v26  ;;  %v2026_v29 = vadd.f32 %v1994_v6, %v1834_v3  ;;  %v4359_v14 = vld [vmem:[#allocation63_spill] sm:$0xff]  ;;  %v4360_v26 = vld [vmem:[#allocation36_spill] sm:$0xff]  ;;  %v2146_v3 = vpop.permute.xlu0 %2145 }
 0x2dc   : > { %2313 = vst [vmem:[%s4041_s27 + $0xa8] sm:$0xff] %v2281_v50 }
 0x2dd   : > { %v1595_v28 = vpop.f32.mrf.mxu2 }
 0x2de   : > { %v2186_v7 = vmul.f32 %v2126_v12, %v1595_v28  ;;  %v1419_v61 = vpop.f32.mrf.mxu0 }
 0x2df   : > { %v1508_v36 = vpop.f32.mrf.mxu1  ;;  %v1835_v38 = vmul.f32 %v4355_v46, %v1419_v61  ;;  %v4362_v46 = vld [vmem:[#allocation18_spill] sm:$0xff] }
 0x2e0   : > { %v2218_v60 = vadd.f32 %v2186_v7, %v2026_v29  ;;  %v1995_v30 = vmul.f32 %v3982_v23, %v1508_v36  ;;  %v2255_v7 = vld [vmem:[%s3114_s3 + $0xd8] sm:$0xff] }
 0x2e2   : > { %v2282_v1 = vadd.f32 %v2250_v11, %v2218_v60  ;;  %v2027_v19 = vadd.f32 %v1995_v30, %v1835_v38  ;;  %v4361_v60 = vld [vmem:[#allocation62_spill] sm:$0xff] }
 0x2e4   : > { %2314 = vst [vmem:[%s4041_s27 + $0xb0] sm:$0xff] %v2282_v1 }
 0x2e5   : > { %v1597_v62 = vpop.f32.mrf.mxu2 }
 0x2e6   : > { %v2187_v16 = vmul.f32 %v2130_v10, %v1597_v62  ;;  %v1422_v41 = vpop.f32.mrf.mxu0 }
 0x2e7   : > { %v1511_v32 = vpop.f32.mrf.mxu1  ;;  %v1836_v34 = vmul.f32 %v3799_v2, %v1422_v41  ;;  %v2138_v2 = vpop.permute.xlu1 %2137  ;;  %v2256_v41 = vld [vmem:[%s3114_s3 + $0xe0] sm:$0xff] }
 0x2e8   : > { %v2219_v49 = vadd.f32 %v2187_v16, %v2027_v19  ;;  %v1996_v48 = vmul.f32 %v3998_v59, %v1511_v32 }
 0x2ea   : > { %v2283_v15 = vadd.f32 %v2251_v35, %v2219_v49  ;;  %v2028_v23 = vadd.f32 %v1996_v48, %v1836_v34  ;;  %v4364_v48 = vld [vmem:[#allocation19_spill] sm:$0xff] }
 0x2ec   : > { %2315 = vst [vmem:[%s4041_s27 + $0xb8] sm:$0xff] %v2283_v15  ;;  %v4363_v15 = vld [vmem:[#allocation61_spill] sm:$0xff] }
 0x2ed   : > { %v1600_v47 = vpop.f32.mrf.mxu2 }
 0x2ee   : > { %v2188_v27 = vmul.f32 %v2134_v57, %v1600_v47  ;;  %v1424_v40 = vpop.f32.mrf.mxu0 }
 0x2ef   : > { %v1513_v51 = vpop.f32.mrf.mxu1  ;;  %v1837_v24 = vmul.f32 %v3793_v25, %v1424_v40  ;;  %v2142_v25 = vpop.permute.xlu2 %2141 }
 0x2f0   : > { %v2220_v18 = vadd.f32 %v2188_v27, %v2028_v23  ;;  %v1997_v55 = vmul.f32 %v4356_v63, %v1513_v51  ;;  %v2150_v30 = vpop.permute.xlu1 %2149  ;;  %v2257_v51 = vld [vmem:[%s3114_s3 + $0xe8] sm:$0xff]  ;;  %v4365_v63 = vld [vmem:[#allocation16_spill] sm:$0xff] }
 0x2f2   : > { %v2284_v42 = vadd.f32 %v2252_v13, %v2220_v18  ;;  %v2029_v59 = vadd.f32 %v1997_v55, %v1837_v24 }
 0x2f4   : > { %2316 = vst [vmem:[%s4041_s27 + $0xc0] sm:$0xff] %v2284_v42 }
 0x2f5   : > { %v1602_v5 = vpop.f32.mrf.mxu2 }
 0x2f6   : > { %v2189_v58 = vmul.f32 %v2138_v2, %v1602_v5  ;;  %v1427_v56 = vpop.f32.mrf.mxu0  ;;  %v4366_v2 = vld [vmem:[#allocation22_spill] sm:$0xff] }
 0x2f7   : > { %v1516_v21 = vpop.f32.mrf.mxu1  ;;  %v1838_v8 = vmul.f32 %v4357_v22, %v1427_v56  ;;  %v2154_v47 = vpop.permute.xlu2 %2153 }
 0x2f8   : > { %v2221_v39 = vadd.f32 %v2189_v58, %v2029_v59  ;;  %v1998_v0 = vmul.f32 %v4358_v43, %v1516_v21  ;;  %v2158_v59 = vpop.permute.xlu0 %2157  ;;  %v2258_v21 = vld [vmem:[%s3114_s3 + $0xf0] sm:$0xff]  ;;  %v4367_v43 = vld [vmem:[#allocation17_spill] sm:$0xff] }
 0x2fa   : > { %v2285_v31 = vadd.f32 %v2253_v44, %v2221_v39  ;;  %v2030_v20 = vadd.f32 %v1998_v0, %v1838_v8 }
 0x2fc   : > { %2317 = vst [vmem:[%s4041_s27 + $0xc8] sm:$0xff] %v2285_v31 }
 0x2fd   : > { %v1605_v4 = vpop.f32.mrf.mxu2 }
 0x2fe   : > { %v2190_v33 = vmul.f32 %v2142_v25, %v1605_v4  ;;  %v1429_v45 = vpop.f32.mrf.mxu0  ;;  %v2162_v4 = vpop.permute.xlu1 %2161 }
 0x2ff   : > { %v1518_v52 = vpop.f32.mrf.mxu1  ;;  %v1839_v53 = vmul.f32 %v4359_v14, %v1429_v45 }
 0x300   : > { %v2222_v9 = vadd.f32 %v2190_v33, %v2030_v20  ;;  %v1999_v50 = vmul.f32 %v4360_v26, %v1518_v52 }
 0x302   : > { %v2286_v54 = vadd.f32 %v2254_v37, %v2222_v9  ;;  %v2031_v12 = vadd.f32 %v1999_v50, %v1839_v53  ;;  %v2259_v37 = vld [vmem:[%s3114_s3 + $0xf8] sm:$0xff] }
 0x304   : > { %2318 = vst [vmem:[%s4041_s27 + $0xd0] sm:$0xff] %v2286_v54 }
 0x305   : > { %v1607_v6 = vpop.f32.mrf.mxu2 }
 0x306   : > { %v2191_v28 = vmul.f32 %v2146_v3, %v1607_v6  ;;  %v1432_v29 = vpop.f32.mrf.mxu0 }
 0x307   : > { %v1521_v61 = vpop.f32.mrf.mxu1  ;;  %v1840_v1 = vmul.f32 %v4361_v60, %v1432_v29 }
 0x308   : > { %v2223_v11 = vadd.f32 %v2191_v28, %v2031_v12  ;;  %v2000_v38 = vmul.f32 %v4362_v46, %v1521_v61 }
 0x30a   : > { %v2287_v36 = vadd.f32 %v2255_v7, %v2223_v11  ;;  %v2032_v62 = vadd.f32 %v2000_v38, %v1840_v1 }
 0x30c   : > { %2319 = vst [vmem:[%s4041_s27 + $0xd8] sm:$0xff] %v2287_v36 }
 0x30d   : > { %v1610_v10 = vpop.f32.mrf.mxu2 }
 0x30e   : > { %v2192_v19 = vmul.f32 %v2150_v30, %v1610_v10  ;;  %v1434_v16 = vpop.f32.mrf.mxu0 }
 0x30f   : > { %v1523_v35 = vpop.f32.mrf.mxu1  ;;  %v1841_v34 = vmul.f32 %v4363_v15, %v1434_v16 }
 0x310   : > { %v2224_v32 = vadd.f32 %v2192_v19, %v2032_v62  ;;  %v2001_v57 = vmul.f32 %v4364_v48, %v1523_v35 }
 0x312   : > { %v2288_v49 = vadd.f32 %v2256_v41, %v2224_v32  ;;  %v2033_v27 = vadd.f32 %v2001_v57, %v1841_v34 }
 0x314   : > { %2320 = vst [vmem:[%s4041_s27 + $0xe0] sm:$0xff] %v2288_v49 }
 0x315   : > { %v1612_v23 = vpop.f32.mrf.mxu2 }
 0x316   : > { %v2193_v40 = vmul.f32 %v2154_v47, %v1612_v23  ;;  %v1437_v13 = vpop.f32.mrf.mxu0 }
 0x317   : > { %v1526_v18 = vpop.f32.mrf.mxu1  ;;  %v1842_v55 = vmul.f32 %v4365_v63, %v1437_v13 }
 0x318   : > { %v2225_v42 = vadd.f32 %v2193_v40, %v2033_v27  ;;  %v2002_v5 = vmul.f32 %v4366_v2, %v1526_v18 }
 0x31a   : > { %v2289_v24 = vadd.f32 %v2257_v51, %v2225_v42  ;;  %v2034_v56 = vadd.f32 %v2002_v5, %v1842_v55 }
 0x31c   : > { %2321 = vst [vmem:[%s4041_s27 + $0xe8] sm:$0xff] %v2289_v24 }
 0x31d   : > { %v1615_v58 = vpop.f32.mrf.mxu2 }
 0x31e   : > { %v2194_v44 = vmul.f32 %v2158_v59, %v1615_v58  ;;  %v1439_v39 = vpop.f32.mrf.mxu0 }
 0x31f   : > { %v1528_v31 = vpop.f32.mrf.mxu1  ;;  %v1843_v0 = vmul.f32 %v4367_v43, %v1439_v39 }
 0x320   : > { %v2226_v22 = vadd.f32 %v2194_v44, %v2034_v56  ;;  %v2003_v25 = vmul.f32 %v4033_v17, %v1528_v31 }
 0x322   : > { %v2290_v8 = vadd.f32 %v2258_v21, %v2226_v22  ;;  %v2035_v33 = vadd.f32 %v2003_v25, %v1843_v0 }
 0x324   : > { %2322 = vst [vmem:[%s4041_s27 + $0xf0] sm:$0xff] %v2290_v8 }
 0x325   : > { %v1617_v20 = vpop.f32.mrf.mxu2 }
 0x326   : > { %v2195_v45 = vmul.f32 %v2162_v4, %v1617_v20 }
 0x328   : > { %v2227_v52 = vadd.f32 %v2195_v45, %v2035_v33 }
 0x32a   : > { %v2291_v9 = vadd.f32 %v2259_v37, %v2227_v52 }
 0x32c   : > { %2323 = vst [vmem:[%s4041_s27 + $0xf8] sm:$0xff] %v2291_v9 }
 0x32d   : > { %2869 = shalt.err (!%p2866_p4)
}
 0x32e   : > { %s2944_s22 = smov 128   ;;  %s2945_s3 = smov 8  }
 0x32f   : > { %2662 = dma.vmem_to_hbm [thread:$0]  (%p3066_p0), %s2338_s14, 4096, %s2340_s16, %s2325_s21, %s2944_s22, %s2944_s22, %s2945_s3  }
 0x330 PF: > { %s2354_s9 = sand.u32 1, %s2912_s18   ;;  %p2676_p5 = pnand %p2486_p3, %p3070_p2 }
 0x331   : > { %s2355_s10 = scalar_lea.sflag [#allocation5], %s2354_s9 }
 0x332   : > { %p2677_p1 = pneg %p2676_p5 }
 0x334   : > { %2907 = dma.done.wait (%p2677_p1), %s2355_s10, 4096  }
 0x335   : > { %2909 = vsyncadd (%p2677_p1), %s2355_s10, 4294963200  ;;  %s22_s23 = sadd.s32 1, %s2932_s23   ;;  %s4368_s21 = sld [smem:[#allocation14_spill]] }
 0x336   : > { %p19_p6 = scmp.ge.s32.totalorder %s22_s23, 4   ;;  %s4369_s22 = sld [smem:[#allocation15_spill]] }
 0x337   : > { %s4370_s18 = smov %s2916_s19  ;;  %s4371_s19 = smov %s2920_s20 }
 0x338   : > { %s4372_s20 = smov %s3028_s6  ;;  %21 = sbr.rel (!%p19_p6) target bundleno = 10 (0xa), region = 114 }
 0x33d   :  { %2361 = vsyncpa [#allocation4], 1 }
 0x33e   :  { %2363 = vsyncpa [#allocation4 + $0x1], 1 }
 0x33f   :  { %2364 = vsyncpa [#allocation7], 1 }
 0x340   :  { %2365 = vsyncpa [#allocation5], 1 }
 0x341   :  { %2367 = vsyncpa [#allocation5 + $0x1], 1 }

</bundles_post_ra>
